<compile_context>
chip_gen: v7x
topology: tpu7x:2x2x1
jax: 0.10.0
libtpu: 0.0.40
codegen_flags: <defaults>
</compile_context>

<pallas_src>
import functools

import jax
import jax.numpy as jnp
from jax.experimental import pallas as pl
from jax.experimental.pallas import tpu as pltpu


def _sage_kernel(x_ref, nb_ref, wl_ref, wr_ref, o_ref, *,
                 agg_method, f_out, concat):
    """One tm-row tile: axis-1 neighbor reduction, two MXU dots, fused write."""
    blk = nb_ref[...].astype(jnp.float32)              # (tm, K, F_in)
    if agg_method in ("mean", "sum"):                  # mean's 1/K folded into W_r
        agg = jnp.sum(blk, axis=1)
    elif agg_method == "max":
        agg = jnp.max(blk, axis=1)
    elif agg_method == "min":
        agg = jnp.min(blk, axis=1)
    else:
        raise ValueError(agg_method)

    x = x_ref[...].astype(jnp.float32)
    xs = jnp.dot(x, wl_ref[...].astype(jnp.float32),
                 preferred_element_type=jnp.float32)   # lin_l(x)
    ns = jnp.dot(agg, wr_ref[...].astype(jnp.float32),
                 preferred_element_type=jnp.float32)   # lin_r(agg)

    if concat:
        # Two lane-aligned (multiple-of-128) halves -> unmasked dense stores.
        o_ref[:, :f_out] = xs.astype(o_ref.dtype)
        o_ref[:, f_out:] = ns.astype(o_ref.dtype)
    else:
        o_ref[...] = (xs + ns).astype(o_ref.dtype)


def _vmem_capacity_bytes():
    try:
        return int(pltpu.get_tpu_info().vmem_capacity_bytes)
    except Exception:
        return 64 << 20          # conservative fallback (v7x per-core VMEM)


def _choose_tm(n, k, f_in, elt_bytes, vmem_cap):
    # Per-buffer cap for the dominant (tm, K, F_in) neigh tile, generation
    # aware: 128 MiB chips (v5e/v6e) afford ~20 MiB tiles; 64 MiB (v7x) keeps
    # the conservative 8 MiB so double-buffers + output + f32 temps still fit.
    neigh_cap = (20 << 20) if vmem_cap >= (100 << 20) else (8 << 20)
    tm = 512
    while tm > 16 and tm * k * f_in * elt_bytes > neigh_cap:
        tm //= 2
    # Keep >= 4 grid steps so both v7x TensorCores get work and each core has
    # >= 2 steps, letting the input double-buffering actually overlap DMAs.
    while tm > 16 and pl.cdiv(n, tm) < 4:
        tm //= 2
    return max(16, tm)


def sage_aggregator(x, neigh_x, w_l, w_r, *, agg_method="mean", concat=False,
                    tm=None, storage_dtype=None):
    """x: (N, F_in), neigh_x: (N, K, F_in), w_l/w_r: (F_in, F_out)."""
    N, F_in = x.shape
    _, K, F_in2 = neigh_x.shape
    assert F_in2 == F_in
    F_out = w_l.shape[1]
    out_dtype = x.dtype
    f_out_eff = 2 * F_out if concat else F_out

    # Optional narrow HBM storage for the bandwidth-dominant operands; the
    # kernel upcasts to f32 for the reduction and accumulates the dots in f32.
    if storage_dtype is not None:
        x = x.astype(storage_dtype)
        neigh_x = neigh_x.astype(storage_dtype)

    # Fold mean's 1/K into W_r so the kernel only does a plain sum reduction.
    scale = (1.0 / K) if agg_method == "mean" else 1.0
    w_r_s = (w_r.astype(jnp.float32) * scale).astype(w_r.dtype)

    # --- node tiling (generation-aware) -------------------------------------
    vmem_cap = _vmem_capacity_bytes()
    elt_in = jnp.dtype(x.dtype).itemsize
    sub = max(8, 32 // elt_in)                      # sublane packing: 8 f32, 16 bf16
    if tm is None:
        tm = _choose_tm(N, K, F_in, elt_in, vmem_cap)
    tm = max(sub, (int(tm) // sub) * sub)

    n_tiles = pl.cdiv(N, tm)
    if n_tiles > 1 and n_tiles % 2:
        n_tiles += 1                                # even grid: balanced across 2 TCs
    n_pad = n_tiles * tm
    if n_pad != N:
        # Padded output rows are sliced off, so zero-padding is safe for
        # mean/sum/max/min alike.
        x = jnp.pad(x, ((0, n_pad - N), (0, 0)))
        neigh_x = jnp.pad(neigh_x, ((0, n_pad - N), (0, 0), (0, 0)))

    # --- VMEM budget: actual tile footprint, no artificial floor ------------
    elt_w = jnp.dtype(w_l.dtype).itemsize
    elt_out = jnp.dtype(out_dtype).itemsize
    est = (2 * tm * K * F_in * elt_in               # neigh_x double buffer
           + 2 * tm * F_in * elt_in                 # x double buffer
           + 2 * tm * f_out_eff * elt_out           # out double buffer
           + 2 * F_in * F_out * elt_w               # two resident weights (once)
           + tm * K * F_in * 4                      # f32 upcast of the neigh block
           + tm * (F_in + 2 * f_out_eff) * 4)       # f32 x / dot temporaries
    est += 8 << 20                                  # compiler headroom
    vmem_limit = int(min((vmem_cap * 3) // 4, est)) # 48 MiB on v7x, 96 MiB on v5e/v6e

    kernel = functools.partial(_sage_kernel, agg_method=agg_method,
                               f_out=F_out, concat=concat)

    call = pl.pallas_call(
        kernel,
        out_shape=jax.ShapeDtypeStruct((n_pad, f_out_eff), out_dtype),
        grid_spec=pltpu.PrefetchScalarGridSpec(
            num_scalar_prefetch=0,
            grid=(n_pad // tm,),
            in_specs=[
                pl.BlockSpec((tm, F_in), lambda i: (i, 0)),
                pl.BlockSpec((tm, K, F_in), lambda i: (i, 0, 0)),
                pl.BlockSpec((F_in, F_out), lambda i: (0, 0)),   # resident W_l
                pl.BlockSpec((F_in, F_out), lambda i: (0, 0)),   # resident W_r/K
            ],
            out_specs=pl.BlockSpec((tm, f_out_eff), lambda i: (i, 0)),
        ),
        compiler_params=pltpu.CompilerParams(
            dimension_semantics=("parallel",),
            vmem_limit_bytes=vmem_limit,
        ),
    )
    out = call(x, neigh_x, w_l, w_r_s)
    if n_pad != N:
        out = out[:N]
    return out


def _reference(x, neigh_x, w_l, w_r, agg_method="mean", concat=False):
    agg_fn = {"mean": jnp.mean, "sum": jnp.sum,
              "max": jnp.max, "min": jnp.min}[agg_method]
    agg = agg_fn(neigh_x, axis=1)
    a = x @ w_l
    b = agg @ w_r
    return jnp.concatenate([a, b], axis=1) if concat else a + b


if __name__ == "__main__":
    # N nodes with K sampled neighbors each, in_features -> out_features.
    N, K, F_in, F_out = 512, 8, 128, 128
    key = jax.random.PRNGKey(0)
    k1, k2, k3, k4 = jax.random.split(key, 4)

    x = jax.random.normal(k1, (N, F_in), dtype=jnp.float32)
    neigh_x = jax.random.normal(k2, (N, K, F_in), dtype=jnp.float32)

    # Deterministic "Linear" weights (bias=False), stored as (F_in, F_out).
    bound = 1.0 / (F_in ** 0.5)
    w_l = jax.random.uniform(k3, (F_in, F_out), jnp.float32, -bound, bound)
    w_r = jax.random.uniform(k4, (F_in, F_out), jnp.float32, -bound, bound)

    # 1) default module config: agg_method='mean', concat=False, bias=False.
    out = jax.block_until_ready(sage_aggregator(x, neigh_x, w_l, w_r))
    ref = _reference(x, neigh_x, w_l, w_r, "mean", False)
    assert out.shape == ref.shape
    assert jnp.allclose(out, ref, atol=2e-4, rtol=2e-4), \
        float(jnp.max(jnp.abs(out - ref)))

    # 2) concat path with a non-mean aggregator.
    out_c = jax.block_until_ready(
        sage_aggregator(x, neigh_x, w_l, w_r, agg_method="max", concat=True))
    ref_c = _reference(x, neigh_x, w_l, w_r, "max", True)
    assert out_c.shape == ref_c.shape
    assert jnp.allclose(out_c, ref_c, atol=2e-4, rtol=2e-4), \
        float(jnp.max(jnp.abs(out_c - ref_c)))

    # 3) bf16 HBM storage of x / neigh_x (~2x less dominant DMA traffic);
    #    compared against a reference using the same bf16-rounded inputs.
    out_b = jax.block_until_ready(
        sage_aggregator(x, neigh_x, w_l, w_r, storage_dtype=jnp.bfloat16))
    xb = x.astype(jnp.bfloat16).astype(jnp.float32)
    nb = neigh_x.astype(jnp.bfloat16).astype(jnp.float32)
    ref_b = _reference(xb, nb, w_l, w_r, "mean", False)
    assert out_b.shape == ref_b.shape
    assert jnp.allclose(out_b, ref_b, atol=1e-2, rtol=1e-2), \
        float(jnp.max(jnp.abs(out_b - ref_b)))

    print("KERNEL_OK")
</pallas_src>

<mosaic_0001>
module attributes {stable_mosaic.version = 11 : i64} {
  func.func @_sage_kernel(%arg0: i32, %arg1: memref<128x128xf32, #tpu.memory_space<vmem>>, %arg2: memref<128x8x128xf32, #tpu.memory_space<vmem>>, %arg3: memref<128x128xf32, #tpu.memory_space<vmem>>, %arg4: memref<128x128xf32, #tpu.memory_space<vmem>>, %arg5: memref<128x128xf32, #tpu.memory_space<vmem>>) attributes {dimension_semantics = [#tpu.dimension_semantics<parallel>], iteration_bounds = array<i64: 4>, scalar_prefetch = 0 : i64, scratch_operands = 0 : i64, tpu.core_type = #tpu.core_type<tc>, window_params = [{transform_indices = @transform_0, window_bounds = array<i64: 128, 128>}, {transform_indices = @transform_1, window_bounds = array<i64: 128, 8, 128>}, {pipeline_mode = #tpu.pipeline_mode<synchronous>, transform_indices = @transform_2, window_bounds = array<i64: 128, 128>}, {pipeline_mode = #tpu.pipeline_mode<synchronous>, transform_indices = @transform_3, window_bounds = array<i64: 128, 128>}, {transform_indices = @transform_4, window_bounds = array<i64: 128, 128>}]} {
    %c0 = arith.constant 0 : index
    %c0_0 = arith.constant 0 : index
    %c0_1 = arith.constant 0 : index
    %0 = vector.load %arg2[%c0, %c0_0, %c0_1] : memref<128x8x128xf32, #tpu.memory_space<vmem>>, vector<128x8x128xf32>
    %cst = arith.constant dense<0.000000e+00> : vector<128x128xf32>
    %1 = vector.multi_reduction <add>, %0, %cst [1] : vector<128x8x128xf32> to vector<128x128xf32>
    %c0_2 = arith.constant 0 : index
    %c0_3 = arith.constant 0 : index
    %2 = vector.load %arg1[%c0_2, %c0_3] : memref<128x128xf32, #tpu.memory_space<vmem>>, vector<128x128xf32>
    %c0_4 = arith.constant 0 : index
    %c0_5 = arith.constant 0 : index
    %3 = vector.load %arg3[%c0_4, %c0_5] : memref<128x128xf32, #tpu.memory_space<vmem>>, vector<128x128xf32>
    %cst_6 = arith.constant dense<0.000000e+00> : vector<128x128xf32>
    %4 = tpu.matmul %2, %3, %cst_6 {dimension_numbers = #tpu.dot_dimension_numbers<[1], [0], [0], [1], [0, 0, 1, 1], [], []>} : vector<128x128xf32>, vector<128x128xf32>, vector<128x128xf32> -> vector<128x128xf32>
    %c0_7 = arith.constant 0 : index
    %c0_8 = arith.constant 0 : index
    %5 = vector.load %arg4[%c0_7, %c0_8] : memref<128x128xf32, #tpu.memory_space<vmem>>, vector<128x128xf32>
    %cst_9 = arith.constant dense<0.000000e+00> : vector<128x128xf32>
    %6 = tpu.matmul %1, %5, %cst_9 {dimension_numbers = #tpu.dot_dimension_numbers<[1], [0], [0], [1], [0, 0, 1, 1], [], []>} : vector<128x128xf32>, vector<128x128xf32>, vector<128x128xf32> -> vector<128x128xf32>
    %7 = arith.addf %4, %6 : vector<128x128xf32>
    %c0_10 = arith.constant 0 : index
    %c0_11 = arith.constant 0 : index
    %8 = vector.load %arg5[%c0_10, %c0_11] : memref<128x128xf32, #tpu.memory_space<vmem>>, vector<128x128xf32>
    tpu.vector_store %arg5[%c0_10, %c0_11], %7 {strides = array<i32>} : memref<128x128xf32, #tpu.memory_space<vmem>>, vector<128x128xf32>,
    return
  }
  func.func @transform_0(%arg0: i32) -> (i32, i32) {
    %c0_i32 = arith.constant 0 : i32
    %c0_i32_0 = arith.constant 0 : i32
    return %arg0, %c0_i32 : i32, i32
  }
  func.func @transform_1(%arg0: i32) -> (i32, i32, i32) {
    %c0_i32 = arith.constant 0 : i32
    %c0_i32_0 = arith.constant 0 : i32
    %c0_i32_1 = arith.constant 0 : i32
    return %arg0, %c0_i32, %c0_i32_0 : i32, i32, i32
  }
  func.func @transform_2(%arg0: i32) -> (i32, i32) {
    %c0_i32 = arith.constant 0 : i32
    %c0_i32_0 = arith.constant 0 : i32
    %c0_i32_1 = arith.constant 0 : i32
    return %c0_i32, %c0_i32_0 : i32, i32
  }
  func.func @transform_3(%arg0: i32) -> (i32, i32) {
    %c0_i32 = arith.constant 0 : i32
    %c0_i32_0 = arith.constant 0 : i32
    %c0_i32_1 = arith.constant 0 : i32
    return %c0_i32, %c0_i32_0 : i32, i32
  }
  func.func @transform_4(%arg0: i32) -> (i32, i32) {
    %c0_i32 = arith.constant 0 : i32
    %c0_i32_0 = arith.constant 0 : i32
    return %arg0, %c0_i32 : i32, i32
  }
}

</mosaic_0001>

<bundles_post_ra>
// kernel: tpu_custom_call.1
= control target key start
LH: loop header
LB: loop body
LE: loop exit
PB: predicated region body
PF: predicated region fallthrough
CT: control target
= control target key end

     0   :  { %s3122_s0 = inlined_call_operand.hbm [shape: f32[512,128], index: 0, kind: input, shape index: {}]   ;;  %s3123_s1 = inlined_call_operand.hbm [shape: f32[512,8,128], index: 1, kind: input, shape index: {}]   ;;  %s3124_s2 = inlined_call_operand.hbm [shape: f32[128,128], index: 2, kind: input, shape index: {}]   ;;  %s3125_s3 = inlined_call_operand.hbm [shape: f32[128,128], index: 3, kind: input, shape index: {}]   ;;  %s3126_s4 = inlined_call_operand.hbm [shape: f32[512,128], index: 4, kind: output, shape index: {}]  }
   0x1   :  { %3130 = sst [smem:[#allocation16_spill]] %s3122_s0 }
   0x2   :  { %3131 = sst [smem:[#allocation17_spill]] %s3124_s2 }
   0x3   :  { %9 = vsyncpa [#allocation3], 0 }
   0x4   :  { %11 = vsyncpa [#allocation3 + $0x1], 0 }
   0x5   :  { %12 = vsyncpa [#allocation6], 0 }
   0x6   :  { %14 = vsyncpa [#allocation6 + $0x1], 0 }
   0x7   :  { %15 = vsyncpa [#allocation9], 0 }
   0x8   :  { %16 = vsyncpa [#allocation4], 0 }
   0x9   :  { %18 = vsyncpa [#allocation4 + $0x1], 0  ;;  %s2517_s15 = smov 0   ;;  %s2519_s16 = smov 0  }
   0xa   :  { %s2521_s17 = smov 0   ;;  %s2523_s18 = smov 0  }
   0xb LB: > { %s2538_s19 = sadd.s32 4294967295, %s2481_s18   ;;  %s1930_s20 = sadd.s32 4294967294, %s2481_s18   ;;  %s2481_s18 = sphi %s2523_s18, %s3152_s18   ;;  %s2477_s17 = sphi %s2521_s17, %s3151_s17   ;;  %s2473_s16 = sphi %s2519_s16, %s3150_s16   ;;  %s2469_s15 = sphi %s2517_s15, %s3149_s15  }
   0xc   : > { %p44_p0 = scmp.ne.s32.totalorder %s2473_s16, %s2469_s15  ;;  %p3127_p1 = scmp.eq.s32.totalorder %s2538_s19, 0 }
   0xd   : > { %p142_p3 = scmp.eq.s32.totalorder %s1930_s20, 3  ;;  %p1931_p5 = scmp.ge.s32.totalorder %s2481_s18, 1 }
   0xe   : > { %p2547_p4 = por %p3127_p1, %p44_p0  ;;  %p149_p7 = scmp.lt.s32.totalorder %s2481_s18, 5 }
   0xf   : > { %p2552_p6 = por %p142_p3, %p44_p0  ;;  %s2483_s24 = smov [#allocation7]  }
  0x10   : > { %s3132_s21 = scalar_select %p2547_p4, 1, 0 }
  0x11   : > { %s3133_s22 = scalar_select %p2552_p6, 1, 0 }
  0x12   : > { %p2557_p8 = pnand %p1931_p5, %p149_p7  ;;  %s161_s25 = sshll.u32 %s2483_s24, 4  ;;  %s162_s25 = int_to_ptr.vmem [resolvable:$true] %s161_s25 }
  0x13   : > { %s2484_s27 = smov [#allocation8]   ;;  %s3136_s2 = sld [smem:[#allocation17_spill]] }
  0x14   : > { %s3134_s23 = scalar_select %p2557_p8, 1, 0 }
  0x15   : > { %p2225_p9 = pneg %p2557_p8  ;;  %s174_s28 = sshll.u32 %s2484_s27, 4  ;;  %s2569_s28 = int_to_ptr.vmem [resolvable:$true] %s174_s28 }
  0x17   : > { %p2565_p10 = pnand %p2225_p9, %p3127_p1 }
  0x19   : > { %s2287_s5 = scalar_lea.hbm %s3136_s2, 2048  ;;  %p2289_p12 = pneg %p2565_p10 }
  0x1a   : > { %p2288_p11 = scmp.ne.s32.totalorder %s3136_s2, %s2287_s5  ;;  %p2294_p3 = scmp.lt.u32.totalorder %s2287_s5, %s3136_s2 }
  0x1c   : > { %p2290_p13 = pnand %p2289_p12, %p2288_p11 }
  0x1e   : > { %p2291_p0 = pneg %p2290_p13 }
  0x20   : > { %p2296_p5 = pnand %p2294_p3, %p2291_p0 }
  0x22   : > { %2299 = shalt.err (!%p2296_p5)
}
  0x23   : > { %s2300_s10 = scalar_lea.vmem %s162_s25, 2048  ;;  %p2308_p2 = scmp.lt.s32.totalorder %s162_s25, %s162_s25 }
  0x24   : > { %p2301_p7 = scmp.ne.s32.totalorder %s162_s25, %s2300_s10  ;;  %p2309_p6 = scmp.lt.s32.totalorder %s2300_s10, %s2300_s10 }
  0x26   : > { %p2303_p9 = pnand %p2301_p7, %p2289_p12  ;;  %p2310_p4 = por %p2309_p6, %p2308_p2 }
  0x28   : > { %p2304_p1 = pneg %p2303_p9 }
  0x2a   : > { %p2311_p8 = pnand %p2310_p4, %p2304_p1 }
  0x2c   : > { %2314 = shalt.err (!%p2311_p8)
}
  0x2d   : > { %s2485_s11 = smov 128   ;;  %s2486_s12 = smov 8  }
  0x2e   : > { %2228 = dma.hbm_to_vmem [thread:$0]  (!%p2565_p10), %s3136_s2, 2048, %s162_s25, [#allocation6], %s2485_s11, %s2485_s11, %s2486_s12  }
  0x2f   : > { %s2315_s27 = scalar_lea.hbm %s3125_s3, 2048 }
  0x30   : > { %p2316_p1 = scmp.ne.s32.totalorder %s3125_s3, %s2315_s27  ;;  %p2322_p6 = scmp.lt.u32.totalorder %s2315_s27, %s3125_s3 }
  0x32   : > { %p2318_p2 = pnand %p2316_p1, %p2289_p12 }
  0x34   : > { %p2319_p4 = pneg %p2318_p2 }
  0x36   : > { %p2324_p8 = pnand %p2322_p6, %p2319_p4 }
  0x38   : > { %2327 = shalt.err (!%p2324_p8)
}
  0x39   : > { %s2328_s25 = scalar_lea.vmem %s2569_s28, 2048  ;;  %p2336_p3 = scmp.lt.s32.totalorder %s2569_s28, %s2569_s28 }
  0x3a   : > { %p2329_p11 = scmp.ne.s32.totalorder %s2569_s28, %s2328_s25  ;;  %p2337_p5 = scmp.lt.s32.totalorder %s2328_s25, %s2328_s25 }
  0x3c   : > { %p2331_p13 = pnand %p2329_p11, %p2289_p12  ;;  %p2338_p7 = por %p2337_p5, %p2336_p3 }
  0x3e   : > { %p2332_p0 = pneg %p2331_p13 }
  0x40   : > { %p2339_p9 = pnand %p2338_p7, %p2332_p0 }
  0x42   : > { %2342 = shalt.err (!%p2339_p9)
}
  0x43   : > { %2231 = dma.hbm_to_vmem [thread:$0]  (!%p2565_p10), %s3125_s3, 2048, %s2569_s28, [#allocation9], %s2485_s11, %s2485_s11, %s2486_s12  }
  0x44   : > { %s2625_s26 = sadd.s32 1, %s2481_s18   ;;  %s31_s9 = sadd.s32 1, %s2477_s17 }
  0x45   : > { %s28_s10 = ssub.s32 %s2481_s18, %s2625_s26  ;;  %p38_p12 = scmp.ne.s32.totalorder %s2477_s17, %s2473_s16 }
  0x46   : > { %p29_p1 = scmp.eq.s32.totalorder %s28_s10, 0  ;;  %p39_p2 = scmp.eq.s32.totalorder %s2481_s18, 0 }
  0x47   : > { %p3137_p4 = scmp.eq.s32.totalorder %s2538_s19, 3  ;;  %p2245_p8 = scmp.lt.s32.totalorder %s2481_s18, 4 }
  0x48   : > { %s2641_s14 = scalar_select %p29_p1, %s2477_s17, %s31_s9  }
  0x49   : > { %p2635_p6 = por %p3137_p4, %p38_p12  ;;  %p40_p11 = por %p39_p2, %p38_p12 }
  0x4a   : > { %s2644_s20 = sand.u32 1, %s2477_s17   ;;  %s1952_s24 = sshll.u32 %s2481_s18, 11 }
  0x4b   : > { %s1935_s28 = sshll.u32 %s2644_s20, 7  ;;  %s3139_s0 = sld [smem:[#allocation16_spill]] }
  0x4c   : > { %s192_s5 = scalar_lea.vmem [#allocation2], %s1935_s28  ;;  %p2655_p10 = pnand %p2245_p8, %p40_p11 }
  0x4d   : > { %s199_s6 = sshll.u32 %s192_s5, 4  ;;  %s1938_s8 = sshll.u32 %s2644_s20, 10  ;;  %s2653_s6 = int_to_ptr.vmem [resolvable:$true] %s199_s6 }
  0x4e   : > { %s189_s9 = scalar_lea.sflag [#allocation3], %s2644_s20  ;;  %p2345_p0 = pneg %p2655_p10 }
  0x51   : > { %s2651_s30 = scalar_lea.hbm %s3139_s0, %s1952_s24  ;;  %s2348_s27 = scalar_lea.hbm %s3139_s0, 8192 }
  0x52   : > { %s2343_s10 = scalar_lea.hbm %s2651_s30, 2048  ;;  %p2349_p7 = scmp.lt.u32.totalorder %s2651_s30, %s3139_s0 }
  0x53   : > { %p2344_p13 = scmp.ne.s32.totalorder %s2651_s30, %s2343_s10  ;;  %p2350_p9 = scmp.lt.u32.totalorder %s2348_s27, %s2343_s10 }
  0x54   : > { %p2352_p1 = scmp.lt.u32.totalorder %s2343_s10, %s2651_s30 }
  0x55   : > { %p2346_p3 = pnand %p2345_p0, %p2344_p13  ;;  %p2351_p12 = por %p2350_p9, %p2349_p7 }
  0x57   : > { %p2347_p5 = pneg %p2346_p3  ;;  %p2353_p2 = por %p2352_p1, %p2351_p12 }
  0x59   : > { %p2354_p4 = pnand %p2353_p2, %p2347_p5 }
  0x5b   : > { %2357 = shalt.err (!%p2354_p4)
}
  0x5c   : > { %s2358_s7 = scalar_lea.vmem %s2653_s6, 2048  ;;  %s2487_s28 = smov [#allocation2]  }
  0x5d   : > { %p2359_p8 = scmp.ne.s32.totalorder %s2653_s6, %s2358_s7  ;;  %s2363_s24 = sshll.u32 %s2487_s28, 4  ;;  %s2364_s24 = int_to_ptr.vmem [resolvable:$false] %s2363_s24 }
  0x5e   : > { %s2365_s29 = scalar_lea.vmem %s2364_s24, 4096  ;;  %p2366_p3 = scmp.lt.s32.totalorder %s2653_s6, %s2364_s24 }
  0x5f   : > { %p2361_p11 = pnand %p2359_p8, %p2345_p0  ;;  %p2367_p7 = scmp.lt.s32.totalorder %s2365_s29, %s2358_s7 }
  0x61   : > { %p2362_p13 = pneg %p2361_p11  ;;  %p2368_p9 = por %p2367_p7, %p2366_p3 }
  0x63   : > { %p2369_p12 = pnand %p2368_p9, %p2362_p13 }
  0x65   : > { %2372 = shalt.err (!%p2369_p12)
}
  0x66   : > { %2235 = dma.hbm_to_vmem [thread:$0]  (!%p2655_p10), %s2651_s30, 2048, %s2653_s6, %s189_s9, %s2485_s11, %s2485_s11, %s2486_s12  }
  0x67   : > { %s1953_s10 = sshll.u32 %s2481_s18, 14  ;;  %s213_s28 = scalar_lea.vmem [#allocation5], %s1938_s8 }
  0x68   : > { %s2696_s5 = scalar_lea.hbm %s3123_s1, %s1953_s10  ;;  %s220_s24 = sshll.u32 %s213_s28, 4  ;;  %s2700_s24 = int_to_ptr.vmem [resolvable:$true] %s220_s24 }
  0x69   : > { %s3141_s29 = sand.u32 1, %s2481_s18   ;;  %s2373_s2 = scalar_lea.hbm %s2696_s5, 16384 }
  0x6a   : > { %s2704_s0 = scalar_lea.sflag [#allocation6], %s3141_s29  ;;  %p2374_p5 = scmp.ne.s32.totalorder %s2696_s5, %s2373_s2 }
  0x6b   : > { %s2378_s20 = scalar_lea.hbm %s3123_s1, 65536  ;;  %p2379_p4 = scmp.lt.u32.totalorder %s2696_s5, %s3123_s1 }
  0x6c   : > { %p2376_p1 = pnand %p2374_p5, %p2345_p0  ;;  %p2380_p8 = scmp.lt.u32.totalorder %s2378_s20, %s2373_s2 }
  0x6d   : > { %p2382_p13 = scmp.lt.u32.totalorder %s2373_s2, %s2696_s5 }
  0x6e   : > { %p2377_p2 = pneg %p2376_p1  ;;  %p2381_p11 = por %p2380_p8, %p2379_p4 }
  0x70   : > { %p2383_p3 = por %p2382_p13, %p2381_p11 }
  0x72   : > { %p2384_p7 = pnand %p2383_p3, %p2377_p2 }
  0x74   : > { %2387 = shalt.err (!%p2384_p7)
}
  0x75   : > { %s2388_s8 = scalar_lea.vmem %s2700_s24, 16384  ;;  %s2488_s27 = smov [#allocation5]  }
  0x76   : > { %p2389_p9 = scmp.ne.s32.totalorder %s2700_s24, %s2388_s8  ;;  %s2393_s7 = sshll.u32 %s2488_s27, 4  ;;  %s2394_s7 = int_to_ptr.vmem [resolvable:$false] %s2393_s7 }
  0x77   : > { %s2395_s28 = scalar_lea.vmem %s2394_s7, 32768  ;;  %p2396_p1 = scmp.lt.s32.totalorder %s2700_s24, %s2394_s7 }
  0x78   : > { %p2391_p12 = pnand %p2389_p9, %p2345_p0  ;;  %p2397_p4 = scmp.lt.s32.totalorder %s2395_s28, %s2388_s8 }
  0x7a   : > { %p2392_p5 = pneg %p2391_p12  ;;  %p2398_p8 = por %p2397_p4, %p2396_p1 }
  0x7c   : > { %p2399_p11 = pnand %p2398_p8, %p2392_p5 }
  0x7e   : > { %2402 = shalt.err (!%p2399_p11)
}
  0x7f   : > { %2238 = dma.hbm_to_vmem [thread:$0]  (!%p2655_p10), %s2696_s5, 16384, %s2700_s24, %s2704_s0, %s2485_s11, %s2485_s11, %s2486_s12  }
  0x80   : > { %p3142_p0 = scmp.ne.s32.totalorder %s3134_s23, 0 }
  0x81   : > { %s2736_s2 = sand.u32 (!%p3142_p0), 1, %s2473_s16   ;;  %p3143_p2 = scmp.ne.s32.totalorder (!%p3142_p0), %s3132_s21, 0 }
  0x82   : > { %232 = sbr.rel (%p3142_p0) target bundleno = 613 (0x265), region = 36  ;;  %s1942_s29 = sshll.u32 (!%p3142_p0), %s2736_s2, 7 }
  0x83   : > { %s235_s30 = scalar_lea.sflag (!%p3142_p0), [#allocation3], %s2736_s2  ;;  %s2742_s25 = scalar_lea.vmem (!%p3142_p0), [#allocation2], %s1942_s29 }
  0x89   : > { %2448 = dma.done.wait (%p3143_p2), %s235_s30, 2048  }
  0x8a   : > { %2450 = vsyncadd (%p3143_p2), %s235_s30, 4294965248  ;;  %s243_s0 = sand.u32 1, %s2538_s19   ;;  %s1943_s23 = sshll.u32 %s2736_s2, 10 }
  0x8b   : > { %s244_s11 = scalar_lea.sflag [#allocation6], %s243_s0  ;;  %s2750_s12 = scalar_lea.vmem [#allocation5], %s1943_s23 }
  0x8c   : > { %2452 = dma.done.wait (%p3143_p2), %s244_s11, 16384  }
  0x8d   : > { %2454 = vsyncadd (%p3143_p2), %s244_s11, 4294950912  ;;  %p3144_p10 = scmp.eq.s32.totalorder %s2538_s19, 0 }
  0x8f   : > { %2456 = dma.done.wait (%p3144_p10), [#allocation6], 2048   ;;  %p3145_p13 = pmov %p3144_p10 }
  0x90   : > { %p3146_p3 = pmov %p3144_p10 }
  0x91   : > { %2458 = vsyncadd (%p3145_p13), [#allocation6], 4294965248 }
  0x92   : > { %2460 = dma.done.wait (%p3146_p3), [#allocation9], 2048   ;;  %p3147_p7 = pmov %p3146_p3 }
  0x93   : > { %v1216_v0 = vld [vmem:[#allocation8] sm:$0xff]  ;;  %v1217_v1 = vld [vmem:[#allocation8 + $0x8] sm:$0xff]  ;;  %v1218_v5 = vld [vmem:[#allocation8 + $0x10] sm:$0xff]  ;;  %vm1360_vm0 = vcmask 1041409   ;;  %vm1362_vm1 = vcmask 1042434   ;;  %vm1364_vm2 = vcmask 1043459  }
  0x94   : > { %2462 = vsyncadd (%p3147_p7), [#allocation9], 4294965248  ;;  %v1200_v2 = vld [vmem:[#allocation7] sm:$0xff]  ;;  %v2131_v3 = vpack.c.bf16 %v1217_v1, %v1216_v0  ;;  %v1201_v4 = vld [vmem:[#allocation7 + $0x8] sm:$0xff]  ;;  %vm1366_vm3 = vcmask 1044484   ;;  %vm1368_vm4 = vcmask 1045509  }
  0x95   : > { %v1219_v6 = vld [vmem:[#allocation8 + $0x18] sm:$0xff]  ;;  %v2163_v7 = vpack.c.bf16 %v1201_v4, %v1200_v2  ;;  %v1202_v9 = vld [vmem:[#allocation7 + $0x10] sm:$0xff]  ;;  %v1220_v11 = vld [vmem:[#allocation8 + $0x20] sm:$0xff]  ;;  %vm1370_vm5 = vcmask 1046534   ;;  %vm1372_vm6 = vcmask 1047559   ;;  %s3054_s21 = scalar_lea.vmem [#allocation10], %s1942_s29 }
  0x96   : > { %v2135_v8 = vpack.c.bf16 %v1219_v6, %v1218_v5  ;;  %v1203_v10 = vld [vmem:[#allocation7 + $0x18] sm:$0xff]  ;;  %2132 = vmatprep.subr.bf16.mxu1 %v2131_v3  ;;  %v1221_v13 = vld [vmem:[#allocation8 + $0x28] sm:$0xff]  ;;  %v1204_v14 = vld [vmem:[#allocation7 + $0x20] sm:$0xff]  ;;  %s1954_s5 = sshll.u32 %s2538_s19, 11  ;;  %s1815_s24 = sshll.u32 %s3054_s21, 4  ;;  %s3077_s24 = int_to_ptr.vmem [resolvable:$true] %s1815_s24 }
  0x97   : > { %v2167_v12 = vpack.c.bf16 %v1203_v10, %v1202_v9  ;;  %v1205_v15 = vld [vmem:[#allocation7 + $0x28] sm:$0xff]  ;;  %2164 = vmatprep.subr.bf16.mxu0 %v2163_v7  ;;  %2134 = vmatpush3.bf16.msra.mxu1 %v2131_v3  ;;  %v1222_v16 = vld [vmem:[#allocation8 + $0x30] sm:$0xff]  ;;  %v1223_v17 = vld [vmem:[#allocation8 + $0x38] sm:$0xff]  ;;  %v2139_v19 = vpack.c.bf16 %v1221_v13, %v1220_v11  ;;  %s3075_s9 = scalar_lea.hbm %s3126_s4, %s1954_s5  ;;  %s1802_s10 = scalar_lea.sflag [#allocation4], %s2736_s2 }
  0x98   : > { %v1206_v18 = vld [vmem:[#allocation7 + $0x30] sm:$0xff]  ;;  %2166 = vmatpush3.bf16.msra.mxu0 %v2163_v7  ;;  %2136 = vmatprep.subr.bf16.mxu1 %v2135_v8  ;;  %v1207_v20 = vld [vmem:[#allocation7 + $0x38] sm:$0xff]  ;;  %v1224_v21 = vld [vmem:[#allocation8 + $0x40] sm:$0xff]  ;;  %v2171_v23 = vpack.c.bf16 %v1205_v15, %v1204_v14  ;;  %v2143_v33 = vpack.c.bf16 %v1223_v17, %v1222_v16  ;;  %s2403_s8 = scalar_lea.vmem %s3077_s24, 2048  ;;  %s2489_s19 = smov [#allocation10]  }
  0x99   : > { %v1225_v22 = vld [vmem:[#allocation8 + $0x48] sm:$0xff]  ;;  %2168 = vmatprep.subr.bf16.mxu0 %v2167_v12  ;;  %v1208_v24 = vld [vmem:[#allocation7 + $0x40] sm:$0xff]  ;;  %v1226_v26 = vld [vmem:[#allocation8 + $0x50] sm:$0xff]  ;;  %v2175_v34 = vpack.c.bf16 %v1207_v20, %v1206_v18  ;;  %p2404_p9 = scmp.ne.s32.totalorder %s3077_s24, %s2403_s8  ;;  %s2407_s27 = sshll.u32 %s2489_s19, 4  ;;  %s2408_s27 = int_to_ptr.vmem [resolvable:$false] %s2407_s27 }
  0x9a   : > { %v1209_v25 = vld [vmem:[#allocation7 + $0x48] sm:$0xff]  ;;  %v1227_v27 = vld [vmem:[#allocation8 + $0x58] sm:$0xff]  ;;  %v1210_v28 = vld [vmem:[#allocation7 + $0x50] sm:$0xff]  ;;  %v2764_v38 = vpack.c.bf16 %v1225_v22, %v1224_v21  ;;  %s2409_s7 = scalar_lea.vmem %s2408_s27, 4096  ;;  %p2410_p1 = scmp.lt.s32.totalorder %s3077_s24, %s2408_s27 }
  0x9b   : > { %v1211_v29 = vld [vmem:[#allocation7 + $0x58] sm:$0xff]  ;;  %2138 = vmatpush3.bf16.msra.mxu1 %v2135_v8  ;;  %v1228_v30 = vld [vmem:[#allocation8 + $0x60] sm:$0xff]  ;;  %v1229_v31 = vld [vmem:[#allocation8 + $0x68] sm:$0xff]  ;;  %v2766_v39 = vpack.c.bf16 %v1209_v25, %v1208_v24  ;;  %v2768_v40 = vpack.c.bf16 %v1227_v27, %v1226_v26  ;;  %p2405_p12 = pnand %p2404_p9, %p2635_p6  ;;  %p2411_p4 = scmp.lt.s32.totalorder %s2409_s7, %s2403_s8 }
  0x9c   : > { %v1212_v32 = vld [vmem:[#allocation7 + $0x60] sm:$0xff]  ;;  %2170 = vmatpush3.bf16.msra.mxu0 %v2167_v12  ;;  %2140 = vmatprep.subr.bf16.mxu1 %v2139_v19  ;;  %v1213_v35 = vld [vmem:[#allocation7 + $0x68] sm:$0xff]  ;;  %v1230_v36 = vld [vmem:[#allocation8 + $0x70] sm:$0xff]  ;;  %v2770_v41 = vpack.c.bf16 %v1211_v29, %v1210_v28  ;;  %v2773_v45 = vpack.c.bf16 %v1229_v31, %v1228_v30 }
  0x9d   : > { %v1231_v37 = vld [vmem:[#allocation8 + $0x78] sm:$0xff]  ;;  %2172 = vmatprep.subr.bf16.mxu0 %v2171_v23  ;;  %v1214_v42 = vld [vmem:[#allocation7 + $0x70] sm:$0xff]  ;;  %v288_v44 = vld [vmem:[%s2750_s12] sm:$0xff]  ;;  %v2775_v46 = vpack.c.bf16 %v1213_v35, %v1212_v32  ;;  %p2406_p5 = pneg %p2405_p12  ;;  %p2412_p8 = por %p2411_p4, %p2410_p1 }
  0x9e   : > { %v1215_v43 = vld [vmem:[#allocation7 + $0x78] sm:$0xff]  ;;  %v2777_v47 = vpack.c.bf16 %v1231_v37, %v1230_v36  ;;  %v289_v48 = vld [vmem:[%s2750_s12 + $0x8] sm:$0xff]  ;;  %v290_v49 = vld [vmem:[%s2750_s12 + $0x10] sm:$0xff]  ;;  %v416_v51 = vrot.slane %v288_v44, 4 }
  0x9f   : > { %v291_v50 = vld [vmem:[%s2750_s12 + $0x18] sm:$0xff]  ;;  %2142 = vmatpush3.bf16.msra.mxu1 %v2139_v19  ;;  %v2782_v52 = vpack.c.bf16 %v1215_v43, %v1214_v42  ;;  %v292_v53 = vld [vmem:[%s2750_s12 + $0x20] sm:$0xff]  ;;  %v293_v54 = vld [vmem:[%s2750_s12 + $0x28] sm:$0xff]  ;;  %v422_v56 = vrot.slane %v289_v48, 4  ;;  %v428_v57 = vrot.slane %v290_v49, 4  ;;  %p2413_p11 = pnand %p2412_p8, %p2406_p5 }
  0xa0   : > { %v294_v55 = vld [vmem:[%s2750_s12 + $0x30] sm:$0xff]  ;;  %v434_v58 = vrot.slane %v291_v50, 4  ;;  %2174 = vmatpush3.bf16.msra.mxu0 %v2171_v23  ;;  %2144 = vmatprep.subr.bf16.mxu1 %v2143_v33  ;;  %v295_v59 = vld [vmem:[%s2750_s12 + $0x38] sm:$0xff]  ;;  %v417_v60 = vadd.f32 %v416_v51, %v288_v44  ;;  %v440_v61 = vrot.slane %v292_v53, 4  ;;  %v446_v62 = vrot.slane %v293_v54, 4  ;;  %v1184_v0 = vld [vmem:[%s2742_s25] sm:$0xff] }
  0xa1   : > { %v452_v63 = vrot.slane %v294_v55, 4  ;;  %2176 = vmatprep.subr.bf16.mxu0 %v2175_v34  ;;  %v423_v1 = vadd.f32 %v422_v56, %v289_v48  ;;  %v429_v2 = vadd.f32 %v428_v57, %v290_v49  ;;  %v458_v4 = vrot.slane %v295_v59, 4  ;;  %2107 = vmatprep.mubr.f32.mxu0 %v1184_v0  ;;  %v296_v29 = vld [vmem:[%s2750_s12 + $0x40] sm:$0xff]  ;;  %v298_v35 = vld [vmem:[%s2750_s12 + $0x50] sm:$0xff]  ;;  %v299_v43 = vld [vmem:[%s2750_s12 + $0x58] sm:$0xff] }
  0xa2   : > { %v435_v3 = vadd.f32 %v434_v58, %v291_v50  ;;  %v418_v5 = vrot.slane %v417_v60, 2  ;;  %v441_v6 = vadd.f32 %v440_v61, %v292_v53  ;;  %v447_v7 = vadd.f32 %v446_v62, %v293_v54  ;;  %v300_v44 = vld [vmem:[%s2750_s12 + $0x60] sm:$0xff]  ;;  %v301_v50 = vld [vmem:[%s2750_s12 + $0x68] sm:$0xff] }
  0xa3   : > { %v453_v8 = vadd.f32 %v452_v63, %v294_v55  ;;  %2146 = vmatpush3.bf16.msra.mxu1 %v2143_v33  ;;  %v424_v9 = vrot.slane %v423_v1, 2  ;;  %v430_v10 = vrot.slane %v429_v2, 2  ;;  %v459_v12 = vadd.f32 %v458_v4, %v295_v59  ;;  %v302_v4 = vld [vmem:[%s2750_s12 + $0x70] sm:$0xff] }
  0xa4   : > { %v436_v11 = vrot.slane %v435_v3, 2  ;;  %2178 = vmatpush3.bf16.msra.mxu0 %v2175_v34  ;;  %2148 = vmatprep.subr.bf16.mxu1 %v2764_v38  ;;  %v419_v13 = vadd.f32 %v418_v5, %v417_v60  ;;  %v442_v14 = vrot.slane %v441_v6, 2  ;;  %v448_v15 = vrot.slane %v447_v7, 2  ;;  %v297_v34 = vld [vmem:[%s2750_s12 + $0x48] sm:$0xff] }
  0xa5   : > { %v454_v16 = vrot.slane %v453_v8, 2  ;;  %2180 = vmatprep.subr.bf16.mxu0 %v2766_v39  ;;  %v425_v17 = vadd.f32 %v424_v9, %v423_v1  ;;  %v431_v18 = vadd.f32 %v430_v10, %v429_v2  ;;  %v460_v20 = vrot.slane %v459_v12, 2  ;;  %v303_v9 = vld [vmem:[%s2750_s12 + $0x78] sm:$0xff] }
  0xa6   : > { %v437_v19 = vadd.f32 %v436_v11, %v435_v3  ;;  %v420_v21 = vrot.slane %v419_v13, 1  ;;  %v443_v22 = vadd.f32 %v442_v14, %v441_v6  ;;  %v449_v23 = vadd.f32 %v448_v15, %v447_v7 }
  0xa7   : > { %v455_v24 = vadd.f32 %v454_v16, %v453_v8  ;;  %2150 = vmatpush3.bf16.msra.mxu1 %v2764_v38  ;;  %v426_v25 = vrot.slane %v425_v17, 1  ;;  %v432_v26 = vrot.slane %v431_v18, 1  ;;  %v461_v28 = vadd.f32 %v460_v20, %v459_v12 }
  0xa8   : > { %v438_v27 = vrot.slane %v437_v19, 1  ;;  %2182 = vmatpush3.bf16.msra.mxu0 %v2766_v39  ;;  %2152 = vmatprep.subr.bf16.mxu1 %v2768_v40  ;;  %v421_v30 = vadd.f32 %v420_v21, %v419_v13  ;;  %v444_v31 = vrot.slane %v443_v22, 1  ;;  %v450_v32 = vrot.slane %v449_v23, 1 }
  0xa9   : > { %v456_v33 = vrot.slane %v455_v24, 1  ;;  %2184 = vmatprep.subr.bf16.mxu0 %v2770_v41  ;;  %v427_v36 = vadd.f32 %v426_v25, %v425_v17  ;;  %v433_v37 = vadd.f32 %v432_v26, %v431_v18  ;;  %v462_v42 = vrot.slane %v461_v28, 1 }
  0xaa   : > { %v439_v38 = vadd.f32 %v438_v27, %v437_v19  ;;  %v445_v48 = vadd.f32 %v444_v31, %v443_v22  ;;  %v451_v49 = vadd.f32 %v450_v32, %v449_v23  ;;  %v464_v51 = vrot.slane %v296_v29, 4  ;;  %v304_v23 = vld [vmem:[%s2750_s12 + $0x80] sm:$0xff] }
  0xab   : > { %v457_v39 = vadd.f32 %v456_v33, %v455_v24  ;;  %2154 = vmatpush3.bf16.msra.mxu1 %v2768_v40  ;;  %v463_v53 = vadd.f32 %v462_v42, %v461_v28  ;;  %v1361_v54 = vsel %vm1360_vm0, %v427_v36, %v421_v30  ;;  %v470_v55 = vrot.slane %v297_v34, 4  ;;  %v1185_v28 = vld [vmem:[%s2742_s25 + $0x8] sm:$0xff]  ;;  %v306_v33 = vld [vmem:[%s2750_s12 + $0x90] sm:$0xff] }
  0xac   : > { %v476_v56 = vrot.slane %v298_v35, 4  ;;  %2186 = vmatpush3.bf16.msra.mxu0 %v2770_v41  ;;  %2156 = vmatprep.subr.bf16.mxu1 %v2773_v45  ;;  %v1363_v57 = vsel %vm1362_vm1, %v433_v37, %v1361_v54  ;;  %v465_v58 = vadd.f32 %v464_v51, %v296_v29  ;;  %v482_v59 = vrot.slane %v299_v43, 4  ;;  %v305_v29 = vld [vmem:[%s2750_s12 + $0x88] sm:$0xff] }
  0xad   : > { %v488_v60 = vrot.slane %v300_v44, 4  ;;  %2188 = vmatprep.subr.bf16.mxu0 %v2775_v46  ;;  %v1365_v61 = vsel %vm1364_vm2, %v439_v38, %v1363_v57  ;;  %v471_v40 = vadd.f32 %v470_v55, %v297_v34  ;;  %v494_v63 = vrot.slane %v301_v50, 4  ;;  %v1186_v34 = vld [vmem:[%s2742_s25 + $0x10] sm:$0xff]  ;;  %v307_v38 = vld [vmem:[%s2750_s12 + $0x98] sm:$0xff] }
  0xae   : > { %v477_v62 = vadd.f32 %v476_v56, %v298_v35  ;;  %v1367_v0 = vsel %vm1366_vm3, %v445_v48, %v1365_v61  ;;  %v466_v1 = vrot.slane %v465_v58, 2  ;;  %v483_v41 = vadd.f32 %v482_v59, %v299_v43  ;;  %v308_v56 = vld [vmem:[%s2750_s12 + $0xa0] sm:$0xff] }
  0xaf   : > { %v489_v2 = vadd.f32 %v488_v60, %v300_v44  ;;  %2158 = vmatpush3.bf16.msra.mxu1 %v2773_v45  ;;  %v1369_v3 = vsel %vm1368_vm4, %v451_v49, %v1367_v0  ;;  %v472_v5 = vrot.slane %v471_v40, 2  ;;  %v495_v7 = vadd.f32 %v494_v63, %v301_v50  ;;  %v1188_v59 = vld [vmem:[%s2742_s25 + $0x20] sm:$0xff] }
  0xb0   : > { %v478_v6 = vrot.slane %v477_v62, 2  ;;  %2190 = vmatpush3.bf16.msra.mxu0 %v2775_v46  ;;  %2160 = vmatprep.subr.bf16.mxu1 %v2777_v47  ;;  %v1371_v8 = vsel %vm1370_vm5, %v457_v39, %v1369_v3  ;;  %v467_v10 = vadd.f32 %v466_v1, %v465_v58  ;;  %v484_v11 = vrot.slane %v483_v41, 2 }
  0xb1   : > { %v490_v12 = vrot.slane %v489_v2, 2  ;;  %2192 = vmatprep.subr.bf16.mxu0 %v2782_v52  ;;  %v1373_v45 = vsel %vm1372_vm6, %v463_v53, %v1371_v8  ;;  %v473_v13 = vadd.f32 %v472_v5, %v471_v40  ;;  %v496_v15 = vrot.slane %v495_v7, 2  ;;  %v1187_v53 = vld [vmem:[%s2742_s25 + $0x18] sm:$0xff]  ;;  %v309_v40 = vld [vmem:[%s2750_s12 + $0xa8] sm:$0xff] }
  0xb2   : > { %v479_v14 = vadd.f32 %v478_v6, %v477_v62  ;;  %2051 = vmatprep.mubr.f32.mxu1 %v1373_v45  ;;  %v468_v16 = vrot.slane %v467_v10, 1  ;;  %v485_v46 = vadd.f32 %v484_v11, %v483_v41  ;;  %v500_v18 = vrot.slane %v302_v4, 4  ;;  %v1190_v45 = vld [vmem:[%s2742_s25 + $0x30] sm:$0xff] }
  0xb3   : > { %v491_v17 = vadd.f32 %v490_v12, %v489_v2  ;;  %2162 = vmatpush3.bf16.msra.mxu1 %v2777_v47  ;;  %v474_v19 = vrot.slane %v473_v13, 1  ;;  %v497_v21 = vadd.f32 %v496_v15, %v495_v7  ;;  %v506_v22 = vrot.slane %v303_v9, 4  ;;  %v1189_v7 = vld [vmem:[%s2742_s25 + $0x28] sm:$0xff] }
  0xb4   : > { %v480_v20 = vrot.slane %v479_v14, 1  ;;  %2194 = vmatpush3.bf16.msra.mxu0 %v2782_v52  ;;  %v469_v24 = vadd.f32 %v468_v16, %v467_v10  ;;  %v486_v25 = vrot.slane %v485_v46, 1  ;;  %v501_v27 = vadd.f32 %v500_v18, %v302_v4 }
  0xb5   : > { %v492_v26 = vrot.slane %v491_v17, 1  ;;  %v475_v30 = vadd.f32 %v474_v19, %v473_v13  ;;  %v498_v32 = vrot.slane %v497_v21, 1  ;;  %v507_v47 = vadd.f32 %v506_v22, %v303_v9  ;;  %v310_v9 = vld [vmem:[%s2750_s12 + $0xb0] sm:$0xff] }
  0xb6   : > { %v481_v31 = vadd.f32 %v480_v20, %v479_v14  ;;  %v487_v35 = vadd.f32 %v486_v25, %v485_v46  ;;  %v502_v37 = vrot.slane %v501_v27, 2  ;;  %v512_v52 = vrot.slane %v304_v23, 4  ;;  %v311_v14 = vld [vmem:[%s2750_s12 + $0xb8] sm:$0xff] }
  0xb7   : > { %v493_v36 = vadd.f32 %v492_v26, %v491_v17  ;;  %v499_v42 = vadd.f32 %v498_v32, %v497_v21  ;;  %v508_v43 = vrot.slane %v507_v47, 2  ;;  %v1374_v44 = vsel %vm1360_vm0, %v475_v30, %v469_v24  ;;  %2108 = vmatmul.mubr.f32.vlgmr.msra.gmra.mrb[0].mxu0 %v1185_v28  ;;  %v312_v21 = vld [vmem:[%s2750_s12 + $0xc0] sm:$0xff]  ;;  %v1191_v26 = vld [vmem:[%s2742_s25 + $0x38] sm:$0xff] }
  0xb8   : > { %v518_v48 = vrot.slane %v305_v29, 4  ;;  %v503_v49 = vadd.f32 %v502_v37, %v501_v27  ;;  %v1375_v39 = vsel %vm1362_vm1, %v481_v31, %v1374_v44  ;;  %v513_v50 = vadd.f32 %v512_v52, %v304_v23  ;;  %2110 = vmatprep.mubr.f32.mxu0 %v1186_v34  ;;  %v1192_v31 = vld [vmem:[%s2742_s25 + $0x40] sm:$0xff]  ;;  %v313_v34 = vld [vmem:[%s2750_s12 + $0xc8] sm:$0xff] }
  0xb9   : > { %v524_v51 = vrot.slane %v306_v33, 4  ;;  %v509_v54 = vadd.f32 %v508_v43, %v507_v47  ;;  %v1376_v55 = vsel %vm1364_vm2, %v487_v35, %v1375_v39  ;;  %v530_v58 = vrot.slane %v307_v38, 4 }
  0xba   : > { %v519_v57 = vadd.f32 %v518_v48, %v305_v29  ;;  %v504_v60 = vrot.slane %v503_v49, 1  ;;  %v1377_v61 = vsel %vm1366_vm3, %v493_v36, %v1376_v55  ;;  %v514_v62 = vrot.slane %v513_v50, 2 }
  0xbb   : > { %v525_v63 = vadd.f32 %v524_v51, %v306_v33  ;;  %v510_v0 = vrot.slane %v509_v54, 1  ;;  %v1378_v1 = vsel %vm1368_vm4, %v499_v42, %v1377_v61  ;;  %v531_v2 = vadd.f32 %v530_v58, %v307_v38  ;;  %2111 = vmatmul.mubr.f32.gmra.mrb[2].mxu0 %v1187_v53  ;;  %v314_v42 = vld [vmem:[%s2750_s12 + $0xd0] sm:$0xff] }
  0xbc   : > { %v520_v41 = vrot.slane %v519_v57, 2  ;;  %v505_v3 = vadd.f32 %v504_v60, %v503_v49  ;;  %v515_v4 = vadd.f32 %v514_v62, %v513_v50  ;;  %v536_v6 = vrot.slane %v308_v56, 4  ;;  %2113 = vmatprep.mubr.f32.mxu0 %v1188_v59  ;;  %v315_v49 = vld [vmem:[%s2750_s12 + $0xd8] sm:$0xff]  ;;  %v1193_v50 = vld [vmem:[%s2742_s25 + $0x48] sm:$0xff]  ;;  %v316_v62 = vld [vmem:[%s2750_s12 + $0xe0] sm:$0xff] }
  0xbd   : > { %v526_v5 = vrot.slane %v525_v63, 2  ;;  %v511_v8 = vadd.f32 %v510_v0, %v509_v54  ;;  %v532_v11 = vrot.slane %v531_v2, 2  ;;  %v542_v12 = vrot.slane %v309_v40, 4 }
  0xbe   : > { %v521_v10 = vadd.f32 %v520_v41, %v519_v57  ;;  %v1379_v13 = vsel %vm1370_vm5, %v505_v3, %v1378_v1  ;;  %v516_v15 = vrot.slane %v515_v4, 1  ;;  %v537_v46 = vadd.f32 %v536_v6, %v308_v56  ;;  %v1194_v56 = vld [vmem:[%s2742_s25 + $0x50] sm:$0xff] }
  0xbf   : > { %v527_v16 = vadd.f32 %v526_v5, %v525_v63  ;;  %v1380_v17 = vsel %vm1372_vm6, %v511_v8, %v1379_v13  ;;  %v533_v19 = vadd.f32 %v532_v11, %v531_v2  ;;  %v543_v20 = vadd.f32 %v542_v12, %v309_v40  ;;  %2114 = vmatmul.mubr.f32.gmra.mrb[4].mxu0 %v1189_v7  ;;  %v317_v2 = vld [vmem:[%s2750_s12 + $0xe8] sm:$0xff]  ;;  %v1195_v5 = vld [vmem:[%s2742_s25 + $0x58] sm:$0xff] }
  0xc0   : > { %v522_v18 = vrot.slane %v521_v10, 1  ;;  %2052 = vmatmul.mubr.f32.vlgmr.msra.gmra.mrb[0].mxu1 %v1380_v17  ;;  %v517_v22 = vadd.f32 %v516_v15, %v515_v4  ;;  %v538_v24 = vrot.slane %v537_v46, 2  ;;  %v548_v25 = vrot.slane %v310_v9, 4  ;;  %2116 = vmatprep.mubr.f32.mxu0 %v1190_v45  ;;  %v319_v15 = vld [vmem:[%s2750_s12 + $0xf8] sm:$0xff] }
  0xc1   : > { %v528_v23 = vrot.slane %v527_v16, 1  ;;  %v534_v28 = vrot.slane %v533_v19, 1  ;;  %v544_v29 = vrot.slane %v543_v20, 2  ;;  %v554_v30 = vrot.slane %v311_v14, 4 }
  0xc2   : > { %v523_v27 = vadd.f32 %v522_v18, %v521_v10  ;;  %v539_v47 = vadd.f32 %v538_v24, %v537_v46  ;;  %v549_v33 = vadd.f32 %v548_v25, %v310_v9  ;;  %v560_v35 = vrot.slane %v312_v21, 4 }
  0xc3   : > { %v529_v32 = vadd.f32 %v528_v23, %v527_v16  ;;  %v535_v36 = vadd.f32 %v534_v28, %v533_v19  ;;  %v545_v37 = vadd.f32 %v544_v29, %v543_v20  ;;  %v555_v38 = vadd.f32 %v554_v30, %v311_v14  ;;  %2117 = vmatmul.mubr.f32.gmra.mrb[6].mxu0 %v1191_v26  ;;  %v318_v14 = vld [vmem:[%s2750_s12 + $0xf0] sm:$0xff] }
  0xc4   : > { %v1381_v52 = vsel %vm1360_vm0, %v523_v27, %v517_v22  ;;  %v540_v43 = vrot.slane %v539_v47, 1  ;;  %v550_v44 = vrot.slane %v549_v33, 2  ;;  %v561_v39 = vadd.f32 %v560_v35, %v312_v21  ;;  %2119 = vmatprep.mubr.f32.mxu0 %v1192_v31  ;;  %v320_v22 = vld [vmem:[%s2750_s12 + $0x100] sm:$0xff] }
  0xc5   : > { %v1382_v48 = vsel %vm1362_vm1, %v529_v32, %v1381_v52  ;;  %v546_v51 = vrot.slane %v545_v37, 1  ;;  %v556_v53 = vrot.slane %v555_v38, 2  ;;  %v566_v55 = vrot.slane %v313_v34, 4 }
  0xc6   : > { %v1383_v54 = vsel %vm1364_vm2, %v535_v36, %v1382_v48  ;;  %v541_v57 = vadd.f32 %v540_v43, %v539_v47  ;;  %v551_v58 = vadd.f32 %v550_v44, %v549_v33  ;;  %v562_v59 = vrot.slane %v561_v39, 2  ;;  %v322_v44 = vld [vmem:[%s2750_s12 + $0x110] sm:$0xff] }
  0xc7   : > { %v572_v60 = vrot.slane %v314_v42, 4  ;;  %v547_v61 = vadd.f32 %v546_v51, %v545_v37  ;;  %v557_v40 = vadd.f32 %v556_v53, %v555_v38  ;;  %v567_v63 = vadd.f32 %v566_v55, %v313_v34  ;;  %2120 = vmatmul.mubr.f32.gmra.mrb[8].mxu0 %v1193_v50  ;;  %v321_v38 = vld [vmem:[%s2750_s12 + $0x108] sm:$0xff]  ;;  %v323_v53 = vld [vmem:[%s2750_s12 + $0x118] sm:$0xff] }
  0xc8   : > { %v578_v0 = vrot.slane %v315_v49, 4  ;;  %v552_v1 = vrot.slane %v551_v58, 1  ;;  %v1384_v41 = vsel %vm1366_vm3, %v541_v57, %v1383_v54  ;;  %v563_v3 = vadd.f32 %v562_v59, %v561_v39  ;;  %2122 = vmatprep.mubr.f32.mxu0 %v1194_v56 }
  0xc9   : > { %v573_v4 = vadd.f32 %v572_v60, %v314_v42  ;;  %v558_v6 = vrot.slane %v557_v40, 1  ;;  %v1385_v7 = vsel %vm1368_vm4, %v547_v61, %v1384_v41  ;;  %v568_v8 = vrot.slane %v567_v63, 2  ;;  %v1196_v41 = vld [vmem:[%s2742_s25 + $0x60] sm:$0xff] }
  0xca   : > { %v579_v9 = vadd.f32 %v578_v0, %v315_v49  ;;  %v553_v10 = vadd.f32 %v552_v1, %v551_v58  ;;  %v564_v11 = vrot.slane %v563_v3, 1  ;;  %v584_v45 = vrot.slane %v316_v62, 4 }
  0xcb   : > { %v574_v12 = vrot.slane %v573_v4, 2  ;;  %v559_v13 = vadd.f32 %v558_v6, %v557_v40  ;;  %v569_v16 = vadd.f32 %v568_v8, %v567_v63  ;;  %v590_v17 = vrot.slane %v317_v2, 4  ;;  %2123 = vmatmul.mubr.f32.gmra.mrb[10].mxu0 %v1195_v5  ;;  %v325_v5 = vld [vmem:[%s2750_s12 + $0x128] sm:$0xff]  ;;  %v326_v8 = vld [vmem:[%s2750_s12 + $0x130] sm:$0xff] }
  0xcc   : > { %v580_v46 = vrot.slane %v579_v9, 2  ;;  %v1386_v18 = vsel %vm1370_vm5, %v553_v10, %v1385_v7  ;;  %v565_v19 = vadd.f32 %v564_v11, %v563_v3  ;;  %v585_v21 = vadd.f32 %v584_v45, %v316_v62  ;;  %v324_v62 = vld [vmem:[%s2750_s12 + $0x120] sm:$0xff]  ;;  %2125 = vmatprep.mubr.f32.mxu0 %v1196_v41 }
  0xcd   : > { %v575_v20 = vadd.f32 %v574_v12, %v573_v4  ;;  %v1387_v23 = vsel %vm1372_vm6, %v559_v13, %v1386_v18  ;;  %v570_v24 = vrot.slane %v569_v16, 1  ;;  %v591_v26 = vadd.f32 %v590_v17, %v317_v2 }
  0xce   : > { %v581_v25 = vadd.f32 %v580_v46, %v579_v9  ;;  %2054 = vmatprep.mubr.f32.mxu1 %v1387_v23  ;;  %v586_v28 = vrot.slane %v585_v21, 2  ;;  %v596_v29 = vrot.slane %v318_v14, 4  ;;  %v602_v30 = vrot.slane %v319_v15, 4  ;;  %v328_v23 = vld [vmem:[%s2750_s12 + $0x140] sm:$0xff] }
  0xcf   : > { %v576_v27 = vrot.slane %v575_v20, 1  ;;  %v571_v31 = vadd.f32 %v570_v24, %v569_v16  ;;  %v592_v47 = vrot.slane %v591_v26, 2  ;;  %v608_v33 = vrot.slane %v320_v22, 4 }
  0xd0   : > { %v582_v32 = vrot.slane %v581_v25, 1  ;;  %v587_v35 = vadd.f32 %v586_v28, %v585_v21  ;;  %v597_v36 = vadd.f32 %v596_v29, %v318_v14  ;;  %v603_v37 = vadd.f32 %v602_v30, %v319_v15  ;;  %v327_v15 = vld [vmem:[%s2750_s12 + $0x138] sm:$0xff] }
  0xd1   : > { %v577_v34 = vadd.f32 %v576_v27, %v575_v20  ;;  %v593_v42 = vadd.f32 %v592_v47, %v591_v26  ;;  %v1388_v43 = vsel %vm1360_vm0, %v571_v31, %v565_v19  ;;  %v609_v48 = vadd.f32 %v608_v33, %v320_v22 }
  0xd2   : > { %v583_v52 = vadd.f32 %v582_v32, %v581_v25  ;;  %v588_v49 = vrot.slane %v587_v35, 1  ;;  %v598_v39 = vrot.slane %v597_v36, 2  ;;  %v604_v50 = vrot.slane %v603_v37, 2 }
  0xd3   : > { %v1389_v51 = vsel %vm1362_vm1, %v577_v34, %v1388_v43  ;;  %v594_v54 = vrot.slane %v593_v42, 1  ;;  %v610_v56 = vrot.slane %v609_v48, 2  ;;  %v614_v57 = vrot.slane %v321_v38, 4 }
  0xd4   : > { %v1390_v55 = vsel %vm1364_vm2, %v583_v52, %v1389_v51  ;;  %v589_v58 = vadd.f32 %v588_v49, %v587_v35  ;;  %v599_v59 = vadd.f32 %v598_v39, %v597_v36  ;;  %v605_v60 = vadd.f32 %v604_v50, %v603_v37  ;;  %v329_v52 = vld [vmem:[%s2750_s12 + $0x148] sm:$0xff] }
  0xd5   : > { %v620_v61 = vrot.slane %v322_v44, 4  ;;  %v595_v40 = vadd.f32 %v594_v54, %v593_v42  ;;  %v611_v63 = vadd.f32 %v610_v56, %v609_v48  ;;  %v615_v0 = vadd.f32 %v614_v57, %v321_v38  ;;  %v330_v48 = vld [vmem:[%s2750_s12 + $0x150] sm:$0xff]  ;;  %v331_v54 = vld [vmem:[%s2750_s12 + $0x158] sm:$0xff] }
  0xd6   : > { %v626_v1 = vrot.slane %v323_v53, 4  ;;  %v600_v2 = vrot.slane %v599_v59, 1  ;;  %v606_v3 = vrot.slane %v605_v60, 1  ;;  %v1391_v4 = vsel %vm1366_vm3, %v589_v58, %v1390_v55 }
  0xd7   : > { %v621_v6 = vadd.f32 %v620_v61, %v322_v44  ;;  %v1392_v7 = vsel %vm1368_vm4, %v595_v40, %v1391_v4  ;;  %v612_v9 = vrot.slane %v611_v63, 1  ;;  %v616_v10 = vrot.slane %v615_v0, 2 }
  0xd8   : > { %v627_v11 = vadd.f32 %v626_v1, %v323_v53  ;;  %v601_v12 = vadd.f32 %v600_v2, %v599_v59  ;;  %v607_v45 = vadd.f32 %v606_v3, %v605_v60  ;;  %v632_v14 = vrot.slane %v324_v62, 4  ;;  %v1197_v2 = vld [vmem:[%s2742_s25 + $0x68] sm:$0xff] }
  0xd9   : > { %v622_v13 = vrot.slane %v621_v6, 2  ;;  %v613_v16 = vadd.f32 %v612_v9, %v611_v63  ;;  %v617_v46 = vadd.f32 %v616_v10, %v615_v0  ;;  %v638_v18 = vrot.slane %v325_v5, 4  ;;  %v332_v63 = vld [vmem:[%s2750_s12 + $0x160] sm:$0xff]  ;;  %2126 = vmatmul.mubr.f32.gmra.mrb[12].mxu0 %v1197_v2  ;;  %v334_v9 = vld [vmem:[%s2750_s12 + $0x170] sm:$0xff] }
  0xda   : > { %v628_v17 = vrot.slane %v627_v11, 2  ;;  %v1393_v19 = vsel %vm1370_vm5, %v601_v12, %v1392_v7  ;;  %v633_v21 = vadd.f32 %v632_v14, %v324_v62  ;;  %v644_v22 = vrot.slane %v326_v8, 4  ;;  %v335_v14 = vld [vmem:[%s2750_s12 + $0x178] sm:$0xff] }
  0xdb   : > { %v623_v20 = vadd.f32 %v622_v13, %v621_v6  ;;  %v1394_v24 = vsel %vm1372_vm6, %v607_v45, %v1393_v19  ;;  %v618_v25 = vrot.slane %v617_v46, 1  ;;  %v639_v27 = vadd.f32 %v638_v18, %v325_v5  ;;  %v333_v6 = vld [vmem:[%s2750_s12 + $0x168] sm:$0xff] }
  0xdc   : > { %v629_v26 = vadd.f32 %v628_v17, %v627_v11  ;;  %2055 = vmatmul.mubr.f32.gmra.mrb[2].mxu1 %v1394_v24  ;;  %v634_v29 = vrot.slane %v633_v21, 2  ;;  %v645_v30 = vadd.f32 %v644_v22, %v326_v8  ;;  %v650_v31 = vrot.slane %v327_v15, 4 }
  0xdd   : > { %v624_v28 = vrot.slane %v623_v20, 1  ;;  %v619_v32 = vadd.f32 %v618_v25, %v617_v46  ;;  %v640_v33 = vrot.slane %v639_v27, 2  ;;  %v656_v34 = vrot.slane %v328_v23, 4 }
  0xde   : > { %v630_v47 = vrot.slane %v629_v26, 1  ;;  %v635_v36 = vadd.f32 %v634_v29, %v633_v21  ;;  %v646_v37 = vrot.slane %v645_v30, 2  ;;  %v651_v38 = vadd.f32 %v650_v31, %v327_v15 }
  0xdf   : > { %v625_v35 = vadd.f32 %v624_v28, %v623_v20  ;;  %v641_v43 = vadd.f32 %v640_v33, %v639_v27  ;;  %v1395_v44 = vsel %vm1360_vm0, %v619_v32, %v613_v16  ;;  %v657_v49 = vadd.f32 %v656_v34, %v328_v23  ;;  %v336_v20 = vld [vmem:[%s2750_s12 + $0x180] sm:$0xff] }
  0xe0   : > { %v631_v42 = vadd.f32 %v630_v47, %v629_v26  ;;  %v636_v39 = vrot.slane %v635_v36, 1  ;;  %v647_v50 = vadd.f32 %v646_v37, %v645_v30  ;;  %v652_v51 = vrot.slane %v651_v38, 2 }
  0xe1   : > { %v1396_v53 = vsel %vm1362_vm1, %v625_v35, %v1395_v44  ;;  %v642_v55 = vrot.slane %v641_v43, 1  ;;  %v658_v57 = vrot.slane %v657_v49, 2  ;;  %v662_v58 = vrot.slane %v329_v52, 4 }
  0xe2   : > { %v1397_v56 = vsel %vm1364_vm2, %v631_v42, %v1396_v53  ;;  %v637_v59 = vadd.f32 %v636_v39, %v635_v36  ;;  %v648_v60 = vrot.slane %v647_v50, 1  ;;  %v653_v61 = vadd.f32 %v652_v51, %v651_v38  ;;  %v338_v39 = vld [vmem:[%s2750_s12 + $0x190] sm:$0xff] }
  0xe3   : > { %v668_v40 = vrot.slane %v330_v48, 4  ;;  %v643_v62 = vadd.f32 %v642_v55, %v641_v43  ;;  %v659_v0 = vadd.f32 %v658_v57, %v657_v49  ;;  %v663_v1 = vadd.f32 %v662_v58, %v329_v52  ;;  %v337_v52 = vld [vmem:[%s2750_s12 + $0x188] sm:$0xff] }
  0xe4   : > { %v674_v41 = vrot.slane %v331_v54, 4  ;;  %v649_v3 = vadd.f32 %v648_v60, %v647_v50  ;;  %v654_v4 = vrot.slane %v653_v61, 1  ;;  %v1398_v5 = vsel %vm1366_vm3, %v637_v59, %v1397_v56 }
  0xe5   : > { %v669_v7 = vadd.f32 %v668_v40, %v330_v48  ;;  %v1399_v8 = vsel %vm1368_vm4, %v643_v62, %v1398_v5  ;;  %v660_v10 = vrot.slane %v659_v0, 1  ;;  %v664_v11 = vrot.slane %v663_v1, 2 }
  0xe6   : > { %v675_v12 = vadd.f32 %v674_v41, %v331_v54  ;;  %v655_v45 = vadd.f32 %v654_v4, %v653_v61  ;;  %v1400_v13 = vsel %vm1370_vm5, %v649_v3, %v1399_v8  ;;  %v680_v16 = vrot.slane %v332_v63, 4  ;;  %v339_v54 = vld [vmem:[%s2750_s12 + $0x198] sm:$0xff]  ;;  %v340_v41 = vld [vmem:[%s2750_s12 + $0x1a0] sm:$0xff] }
  0xe7   : > { %v670_v15 = vrot.slane %v669_v7, 2  ;;  %v661_v46 = vadd.f32 %v660_v10, %v659_v0  ;;  %v665_v17 = vadd.f32 %v664_v11, %v663_v1  ;;  %v686_v19 = vrot.slane %v333_v6, 4  ;;  %v342_v11 = vld [vmem:[%s2750_s12 + $0x1b0] sm:$0xff] }
  0xe8   : > { %v676_v18 = vrot.slane %v675_v12, 2  ;;  %v1401_v21 = vsel %vm1372_vm6, %v655_v45, %v1400_v13  ;;  %v681_v23 = vadd.f32 %v680_v16, %v332_v63  ;;  %v692_v24 = vrot.slane %v334_v9, 4  ;;  %v1198_v63 = vld [vmem:[%s2742_s25 + $0x70] sm:$0xff] }
  0xe9   : > { %v671_v22 = vadd.f32 %v670_v15, %v669_v7  ;;  %2057 = vmatprep.mubr.f32.mxu1 %v1401_v21  ;;  %v666_v25 = vrot.slane %v665_v17, 1  ;;  %v687_v27 = vadd.f32 %v686_v19, %v333_v6  ;;  %v698_v28 = vrot.slane %v335_v14, 4  ;;  %2128 = vmatprep.mubr.f32.mxu0 %v1198_v63  ;;  %v341_v6 = vld [vmem:[%s2750_s12 + $0x1a8] sm:$0xff] }
  0xea   : > { %v677_v26 = vadd.f32 %v676_v18, %v675_v12  ;;  %v682_v30 = vrot.slane %v681_v23, 2  ;;  %v693_v31 = vadd.f32 %v692_v24, %v334_v9  ;;  %v704_v32 = vrot.slane %v336_v20, 4  ;;  %v343_v12 = vld [vmem:[%s2750_s12 + $0x1b8] sm:$0xff] }
  0xeb   : > { %v672_v29 = vrot.slane %v671_v22, 1  ;;  %v667_v47 = vadd.f32 %v666_v25, %v665_v17  ;;  %v688_v34 = vrot.slane %v687_v27, 2  ;;  %v699_v35 = vadd.f32 %v698_v28, %v335_v14  ;;  %v344_v17 = vld [vmem:[%s2750_s12 + $0x1c0] sm:$0xff] }
  0xec   : > { %v678_v33 = vrot.slane %v677_v26, 1  ;;  %v683_v37 = vadd.f32 %v682_v30, %v681_v23  ;;  %v694_v38 = vrot.slane %v693_v31, 2  ;;  %v705_v42 = vadd.f32 %v704_v32, %v336_v20 }
  0xed   : > { %v673_v36 = vadd.f32 %v672_v29, %v671_v22  ;;  %v689_v44 = vadd.f32 %v688_v34, %v687_v27  ;;  %v700_v48 = vrot.slane %v699_v35, 2  ;;  %v1402_v49 = vsel %vm1360_vm0, %v667_v47, %v661_v46 }
  0xee   : > { %v679_v43 = vadd.f32 %v678_v33, %v677_v26  ;;  %v684_v50 = vrot.slane %v683_v37, 1  ;;  %v695_v51 = vadd.f32 %v694_v38, %v693_v31  ;;  %v706_v55 = vrot.slane %v705_v42, 2 }
  0xef   : > { %v1403_v53 = vsel %vm1362_vm1, %v673_v36, %v1402_v49  ;;  %v690_v56 = vrot.slane %v689_v44, 1  ;;  %v701_v57 = vadd.f32 %v700_v48, %v699_v35  ;;  %v710_v59 = vrot.slane %v337_v52, 4 }
  0xf0   : > { %v1404_v58 = vsel %vm1364_vm2, %v679_v43, %v1403_v53  ;;  %v685_v60 = vadd.f32 %v684_v50, %v683_v37  ;;  %v696_v61 = vrot.slane %v695_v51, 1  ;;  %v707_v40 = vadd.f32 %v706_v55, %v705_v42  ;;  %v345_v43 = vld [vmem:[%s2750_s12 + $0x1c8] sm:$0xff] }
  0xf1   : > { %v716_v62 = vrot.slane %v338_v39, 4  ;;  %v691_v0 = vadd.f32 %v690_v56, %v689_v44  ;;  %v702_v1 = vrot.slane %v701_v57, 1  ;;  %v711_v2 = vadd.f32 %v710_v59, %v337_v52  ;;  %v347_v56 = vld [vmem:[%s2750_s12 + $0x1d8] sm:$0xff] }
  0xf2   : > { %v722_v3 = vrot.slane %v339_v54, 4  ;;  %v697_v4 = vadd.f32 %v696_v61, %v695_v51  ;;  %v1405_v5 = vsel %vm1366_vm3, %v685_v60, %v1404_v58  ;;  %v708_v7 = vrot.slane %v707_v40, 1 }
  0xf3   : > { %v717_v8 = vadd.f32 %v716_v62, %v338_v39  ;;  %v703_v9 = vadd.f32 %v702_v1, %v701_v57  ;;  %v1406_v10 = vsel %vm1368_vm4, %v691_v0, %v1405_v5  ;;  %v712_v45 = vrot.slane %v711_v2, 2  ;;  %v346_v39 = vld [vmem:[%s2750_s12 + $0x1d0] sm:$0xff]  ;;  %v1199_v0 = vld [vmem:[%s2742_s25 + $0x78] sm:$0xff] }
  0xf4   : > { %v723_v13 = vadd.f32 %v722_v3, %v339_v54  ;;  %v1407_v14 = vsel %vm1370_vm5, %v697_v4, %v1406_v10  ;;  %v709_v15 = vadd.f32 %v708_v7, %v707_v40  ;;  %v728_v46 = vrot.slane %v340_v41, 4  ;;  %2129 = vmatmul.mubr.f32.gmra.mrb[14].mxu0 %v1199_v0 }
  0xf5   : > { %v718_v16 = vrot.slane %v717_v8, 2  ;;  %v1408_v18 = vsel %vm1372_vm6, %v703_v9, %v1407_v14  ;;  %v713_v19 = vadd.f32 %v712_v45, %v711_v2  ;;  %v734_v21 = vrot.slane %v341_v6, 4  ;;  %v349_v2 = vld [vmem:[%s2750_s12 + $0x1e8] sm:$0xff]  ;;  %v350_v9 = vld [vmem:[%s2750_s12 + $0x1f0] sm:$0xff] }
  0xf6   : > { %v724_v20 = vrot.slane %v723_v13, 2  ;;  %2058 = vmatmul.mubr.f32.gmra.mrb[4].mxu1 %v1408_v18  ;;  %v729_v23 = vadd.f32 %v728_v46, %v340_v41  ;;  %v740_v24 = vrot.slane %v342_v11, 4  ;;  %v746_v25 = vrot.slane %v343_v12, 4  ;;  %v348_v41 = vld [vmem:[%s2750_s12 + $0x1e0] sm:$0xff] }
  0xf7   : > { %v719_v22 = vadd.f32 %v718_v16, %v717_v8  ;;  %v714_v26 = vrot.slane %v713_v19, 1  ;;  %v735_v28 = vadd.f32 %v734_v21, %v341_v6  ;;  %v752_v29 = vrot.slane %v344_v17, 4  ;;  %v352_v18 = vld [vmem:[%s2750_s12 + $0x200] sm:$0xff] }
  0xf8   : > { %v725_v27 = vadd.f32 %v724_v20, %v723_v13  ;;  %v730_v31 = vrot.slane %v729_v23, 2  ;;  %v741_v32 = vadd.f32 %v740_v24, %v342_v11  ;;  %v747_v47 = vadd.f32 %v746_v25, %v343_v12  ;;  %v351_v12 = vld [vmem:[%s2750_s12 + $0x1f8] sm:$0xff] }
  0xf9   : > { %v720_v30 = vrot.slane %v719_v22, 1  ;;  %v715_v33 = vadd.f32 %v714_v26, %v713_v19  ;;  %v736_v35 = vrot.slane %v735_v28, 2  ;;  %v753_v36 = vadd.f32 %v752_v29, %v344_v17 }
  0xfa   : > { %v726_v34 = vrot.slane %v725_v27, 1  ;;  %v731_v38 = vadd.f32 %v730_v31, %v729_v23  ;;  %v742_v52 = vrot.slane %v741_v32, 2  ;;  %v748_v42 = vrot.slane %v747_v47, 2 }
  0xfb   : > { %v721_v37 = vadd.f32 %v720_v30, %v719_v22  ;;  %v737_v48 = vadd.f32 %v736_v35, %v735_v28  ;;  %v1409_v49 = vsel %vm1360_vm0, %v715_v33, %v709_v15  ;;  %v754_v50 = vrot.slane %v753_v36, 2 }
  0xfc   : > { %v727_v44 = vadd.f32 %v726_v34, %v725_v27  ;;  %v732_v51 = vrot.slane %v731_v38, 1  ;;  %v743_v53 = vadd.f32 %v742_v52, %v741_v32  ;;  %v749_v54 = vadd.f32 %v748_v42, %v747_v47 }
  0xfd   : > { %v1410_v55 = vsel %vm1362_vm1, %v721_v37, %v1409_v49  ;;  %v738_v57 = vrot.slane %v737_v48, 1  ;;  %v755_v59 = vadd.f32 %v754_v50, %v753_v36  ;;  %v758_v60 = vrot.slane %v345_v43, 4  ;;  %v354_v50 = vld [vmem:[%s2750_s12 + $0x210] sm:$0xff] }
  0xfe   : > { %v1411_v58 = vsel %vm1364_vm2, %v727_v44, %v1410_v55  ;;  %v733_v61 = vadd.f32 %v732_v51, %v731_v38  ;;  %v744_v40 = vrot.slane %v743_v53, 1  ;;  %v750_v62 = vrot.slane %v749_v54, 1  ;;  %v353_v44 = vld [vmem:[%s2750_s12 + $0x208] sm:$0xff] }
  0xff   : > { %v764_v63 = vrot.slane %v346_v39, 4  ;;  %v739_v1 = vadd.f32 %v738_v57, %v737_v48  ;;  %v756_v3 = vrot.slane %v755_v59, 1  ;;  %v759_v4 = vadd.f32 %v758_v60, %v345_v43  ;;  %v355_v57 = vld [vmem:[%s2750_s12 + $0x218] sm:$0xff]  ;;  %v356_v60 = vld [vmem:[%s2750_s12 + $0x220] sm:$0xff] }
 0x100   : > { %v770_v5 = vrot.slane %v347_v56, 4  ;;  %v745_v6 = vadd.f32 %v744_v40, %v743_v53  ;;  %v751_v7 = vadd.f32 %v750_v62, %v749_v54  ;;  %v1412_v8 = vsel %vm1366_vm3, %v733_v61, %v1411_v58 }
 0x101   : > { %v765_v10 = vadd.f32 %v764_v63, %v346_v39  ;;  %v1413_v11 = vsel %vm1368_vm4, %v739_v1, %v1412_v8  ;;  %v757_v45 = vadd.f32 %v756_v3, %v755_v59  ;;  %v760_v13 = vrot.slane %v759_v4, 2  ;;  %v358_v8 = vld [vmem:[%s2750_s12 + $0x230] sm:$0xff] }
 0x102   : > { %v771_v14 = vadd.f32 %v770_v5, %v347_v56  ;;  %v1414_v15 = vsel %vm1370_vm5, %v745_v6, %v1413_v11  ;;  %v776_v46 = vrot.slane %v348_v41, 4  ;;  %v782_v17 = vrot.slane %v349_v2, 4 }
 0x103   : > { %v766_v16 = vrot.slane %v765_v10, 2  ;;  %v1415_v19 = vsel %vm1372_vm6, %v751_v7, %v1414_v15  ;;  %v761_v20 = vadd.f32 %v760_v13, %v759_v4  ;;  %v788_v22 = vrot.slane %v350_v9, 4 }
 0x104   : > { %v772_v21 = vrot.slane %v771_v14, 2  ;;  %2060 = vmatprep.mubr.f32.mxu1 %v1415_v19  ;;  %v777_v24 = vadd.f32 %v776_v46, %v348_v41  ;;  %v783_v25 = vadd.f32 %v782_v17, %v349_v2  ;;  %v794_v26 = vrot.slane %v351_v12, 4  ;;  %v357_v2 = vld [vmem:[%s2750_s12 + $0x228] sm:$0xff] }
 0x105   : > { %v767_v23 = vadd.f32 %v766_v16, %v765_v10  ;;  %v762_v27 = vrot.slane %v761_v20, 1  ;;  %v789_v29 = vadd.f32 %v788_v22, %v350_v9  ;;  %v800_v30 = vrot.slane %v352_v18, 4 }
 0x106   : > { %v773_v28 = vadd.f32 %v772_v21, %v771_v14  ;;  %v778_v32 = vrot.slane %v777_v24, 2  ;;  %v784_v47 = vrot.slane %v783_v25, 2  ;;  %v795_v33 = vadd.f32 %v794_v26, %v351_v12  ;;  %v359_v12 = vld [vmem:[%s2750_s12 + $0x238] sm:$0xff] }
 0x107   : > { %v768_v31 = vrot.slane %v767_v23, 1  ;;  %v763_v34 = vadd.f32 %v762_v27, %v761_v20  ;;  %v790_v36 = vrot.slane %v789_v29, 2  ;;  %v801_v37 = vadd.f32 %v800_v30, %v352_v18  ;;  %v360_v18 = vld [vmem:[%s2750_s12 + $0x240] sm:$0xff] }
 0x108   : > { %v774_v35 = vrot.slane %v773_v28, 1  ;;  %v779_v52 = vadd.f32 %v778_v32, %v777_v24  ;;  %v785_v42 = vadd.f32 %v784_v47, %v783_v25  ;;  %v796_v43 = vrot.slane %v795_v33, 2 }
 0x109   : > { %v769_v38 = vadd.f32 %v768_v31, %v767_v23  ;;  %v791_v49 = vadd.f32 %v790_v36, %v789_v29  ;;  %v1416_v39 = vsel %vm1360_vm0, %v763_v34, %v757_v45  ;;  %v802_v51 = vrot.slane %v801_v37, 2 }
 0x10a   : > { %v775_v48 = vadd.f32 %v774_v35, %v773_v28  ;;  %v780_v53 = vrot.slane %v779_v52, 1  ;;  %v786_v54 = vrot.slane %v785_v42, 1  ;;  %v797_v55 = vadd.f32 %v796_v43, %v795_v33 }
 0x10b   : > { %v1417_v56 = vsel %vm1362_vm1, %v769_v38, %v1416_v39  ;;  %v792_v58 = vrot.slane %v791_v49, 1  ;;  %v803_v61 = vadd.f32 %v802_v51, %v801_v37  ;;  %v806_v40 = vrot.slane %v353_v44, 4 }
 0x10c   : > { %v1418_v59 = vsel %vm1364_vm2, %v775_v48, %v1417_v56  ;;  %v781_v62 = vadd.f32 %v780_v53, %v779_v52  ;;  %v787_v63 = vadd.f32 %v786_v54, %v785_v42  ;;  %v798_v0 = vrot.slane %v797_v55, 1 }
 0x10d   : > { %v812_v1 = vrot.slane %v354_v50, 4  ;;  %v793_v41 = vadd.f32 %v792_v58, %v791_v49  ;;  %v804_v3 = vrot.slane %v803_v61, 1  ;;  %v807_v4 = vadd.f32 %v806_v40, %v353_v44  ;;  %v361_v44 = vld [vmem:[%s2750_s12 + $0x248] sm:$0xff] }
 0x10e   : > { %v818_v5 = vrot.slane %v355_v57, 4  ;;  %v799_v6 = vadd.f32 %v798_v0, %v797_v55  ;;  %v1419_v7 = vsel %vm1366_vm3, %v781_v62, %v1418_v59  ;;  %v824_v10 = vrot.slane %v356_v60, 4 }
 0x10f   : > { %v813_v9 = vadd.f32 %v812_v1, %v354_v50  ;;  %v1420_v11 = vsel %vm1368_vm4, %v787_v63, %v1419_v7  ;;  %v805_v45 = vadd.f32 %v804_v3, %v803_v61  ;;  %v808_v13 = vrot.slane %v807_v4, 2  ;;  %v362_v50 = vld [vmem:[%s2750_s12 + $0x250] sm:$0xff] }
 0x110   : > { %v819_v14 = vadd.f32 %v818_v5, %v355_v57  ;;  %v1421_v15 = vsel %vm1370_vm5, %v793_v41, %v1420_v11  ;;  %v825_v46 = vadd.f32 %v824_v10, %v356_v60  ;;  %v830_v17 = vrot.slane %v357_v2, 4  ;;  %v363_v57 = vld [vmem:[%s2750_s12 + $0x258] sm:$0xff]  ;;  %v364_v60 = vld [vmem:[%s2750_s12 + $0x260] sm:$0xff] }
 0x111   : > { %v814_v16 = vrot.slane %v813_v9, 2  ;;  %v1422_v19 = vsel %vm1372_vm6, %v799_v6, %v1421_v15  ;;  %v809_v20 = vadd.f32 %v808_v13, %v807_v4  ;;  %v836_v22 = vrot.slane %v358_v8, 4  ;;  %v368_v15 = vld [vmem:[%s2750_s12 + $0x280] sm:$0xff] }
 0x112   : > { %v820_v21 = vrot.slane %v819_v14, 2  ;;  %2061 = vmatmul.mubr.f32.gmra.mrb[6].mxu1 %v1422_v19  ;;  %v826_v24 = vrot.slane %v825_v46, 2  ;;  %v831_v25 = vadd.f32 %v830_v17, %v357_v2  ;;  %v842_v26 = vrot.slane %v359_v12, 4  ;;  %v365_v2 = vld [vmem:[%s2750_s12 + $0x268] sm:$0xff] }
 0x113   : > { %v815_v23 = vadd.f32 %v814_v16, %v813_v9  ;;  %v810_v27 = vrot.slane %v809_v20, 1  ;;  %v837_v29 = vadd.f32 %v836_v22, %v358_v8  ;;  %v848_v30 = vrot.slane %v360_v18, 4  ;;  %v366_v8 = vld [vmem:[%s2750_s12 + $0x270] sm:$0xff]  ;;  %v367_v9 = vld [vmem:[%s2750_s12 + $0x278] sm:$0xff] }
 0x114   : > { %v821_v28 = vadd.f32 %v820_v21, %v819_v14  ;;  %v827_v32 = vadd.f32 %v826_v24, %v825_v46  ;;  %v832_v47 = vrot.slane %v831_v25, 2  ;;  %v843_v33 = vadd.f32 %v842_v26, %v359_v12 }
 0x115   : > { %v816_v31 = vrot.slane %v815_v23, 1  ;;  %v811_v34 = vadd.f32 %v810_v27, %v809_v20  ;;  %v838_v36 = vrot.slane %v837_v29, 2  ;;  %v849_v37 = vadd.f32 %v848_v30, %v360_v18 }
 0x116   : > { %v822_v35 = vrot.slane %v821_v28, 1  ;;  %v828_v52 = vrot.slane %v827_v32, 1  ;;  %v833_v42 = vadd.f32 %v832_v47, %v831_v25  ;;  %v844_v43 = vrot.slane %v843_v33, 2 }
 0x117   : > { %v817_v38 = vadd.f32 %v816_v31, %v815_v23  ;;  %v839_v49 = vadd.f32 %v838_v36, %v837_v29  ;;  %v1423_v39 = vsel %vm1360_vm0, %v811_v34, %v805_v45  ;;  %v850_v51 = vrot.slane %v849_v37, 2 }
 0x118   : > { %v823_v48 = vadd.f32 %v822_v35, %v821_v28  ;;  %v829_v53 = vadd.f32 %v828_v52, %v827_v32  ;;  %v834_v54 = vrot.slane %v833_v42, 1  ;;  %v845_v55 = vadd.f32 %v844_v43, %v843_v33  ;;  %v369_v43 = vld [vmem:[%s2750_s12 + $0x288] sm:$0xff] }
 0x119   : > { %v1424_v56 = vsel %vm1362_vm1, %v817_v38, %v1423_v39  ;;  %v840_v58 = vrot.slane %v839_v49, 1  ;;  %v851_v61 = vadd.f32 %v850_v51, %v849_v37  ;;  %v854_v40 = vrot.slane %v361_v44, 4  ;;  %v370_v51 = vld [vmem:[%s2750_s12 + $0x290] sm:$0xff] }
 0x11a   : > { %v1425_v59 = vsel %vm1364_vm2, %v823_v48, %v1424_v56  ;;  %v835_v62 = vadd.f32 %v834_v54, %v833_v42  ;;  %v846_v63 = vrot.slane %v845_v55, 1  ;;  %v860_v1 = vrot.slane %v362_v50, 4  ;;  %v371_v56 = vld [vmem:[%s2750_s12 + $0x298] sm:$0xff] }
 0x11b   : > { %v1426_v0 = vsel %vm1366_vm3, %v829_v53, %v1425_v59  ;;  %v841_v41 = vadd.f32 %v840_v58, %v839_v49  ;;  %v852_v3 = vrot.slane %v851_v61, 1  ;;  %v855_v4 = vadd.f32 %v854_v40, %v361_v44 }
 0x11c   : > { %v866_v5 = vrot.slane %v363_v57, 4  ;;  %v847_v6 = vadd.f32 %v846_v63, %v845_v55  ;;  %v1427_v7 = vsel %vm1368_vm4, %v835_v62, %v1426_v0  ;;  %v861_v10 = vadd.f32 %v860_v1, %v362_v50  ;;  %v373_v0 = vld [vmem:[%s2750_s12 + $0x2a8] sm:$0xff] }
 0x11d   : > { %v872_v11 = vrot.slane %v364_v60, 4  ;;  %v1428_v12 = vsel %vm1370_vm5, %v841_v41, %v1427_v7  ;;  %v853_v45 = vadd.f32 %v852_v3, %v851_v61  ;;  %v856_v13 = vrot.slane %v855_v4, 2  ;;  %v372_v61 = vld [vmem:[%s2750_s12 + $0x2a0] sm:$0xff] }
 0x11e   : > { %v867_v14 = vadd.f32 %v866_v5, %v363_v57  ;;  %v1429_v16 = vsel %vm1372_vm6, %v847_v6, %v1428_v12  ;;  %v862_v46 = vrot.slane %v861_v10, 2  ;;  %v878_v18 = vrot.slane %v365_v2, 4 }
 0x11f   : > { %v873_v17 = vadd.f32 %v872_v11, %v364_v60  ;;  %2063 = vmatprep.mubr.f32.mxu1 %v1429_v16  ;;  %v857_v19 = vadd.f32 %v856_v13, %v855_v4  ;;  %v884_v21 = vrot.slane %v366_v8, 4  ;;  %v890_v22 = vrot.slane %v367_v9, 4  ;;  %v374_v4 = vld [vmem:[%s2750_s12 + $0x2b0] sm:$0xff] }
 0x120   : > { %v868_v20 = vrot.slane %v867_v14, 2  ;;  %v863_v23 = vadd.f32 %v862_v46, %v861_v10  ;;  %v879_v25 = vadd.f32 %v878_v18, %v365_v2  ;;  %v896_v26 = vrot.slane %v368_v15, 4 }
 0x121   : > { %v874_v24 = vrot.slane %v873_v17, 2  ;;  %v858_v27 = vrot.slane %v857_v19, 1  ;;  %v885_v29 = vadd.f32 %v884_v21, %v366_v8  ;;  %v891_v30 = vadd.f32 %v890_v22, %v367_v9  ;;  %v375_v8 = vld [vmem:[%s2750_s12 + $0x2b8] sm:$0xff] }
 0x122   : > { %v869_v28 = vadd.f32 %v868_v20, %v867_v14  ;;  %v864_v31 = vrot.slane %v863_v23, 1  ;;  %v880_v47 = vrot.slane %v879_v25, 2  ;;  %v897_v33 = vadd.f32 %v896_v26, %v368_v15  ;;  %v376_v15 = vld [vmem:[%s2750_s12 + $0x2c0] sm:$0xff] }
 0x123   : > { %v875_v32 = vadd.f32 %v874_v24, %v873_v17  ;;  %v859_v34 = vadd.f32 %v858_v27, %v857_v19  ;;  %v886_v36 = vrot.slane %v885_v29, 2  ;;  %v892_v37 = vrot.slane %v891_v30, 2 }
 0x124   : > { %v870_v35 = vrot.slane %v869_v28, 1  ;;  %v865_v38 = vadd.f32 %v864_v31, %v863_v23  ;;  %v881_v42 = vadd.f32 %v880_v47, %v879_v25  ;;  %v898_v44 = vrot.slane %v897_v33, 2 }
 0x125   : > { %v876_v52 = vrot.slane %v875_v32, 1  ;;  %v887_v49 = vadd.f32 %v886_v36, %v885_v29  ;;  %v893_v39 = vadd.f32 %v892_v37, %v891_v30  ;;  %v1430_v50 = vsel %vm1360_vm0, %v859_v34, %v853_v45 }
 0x126   : > { %v871_v48 = vadd.f32 %v870_v35, %v869_v28  ;;  %v882_v54 = vrot.slane %v881_v42, 1  ;;  %v1431_v55 = vsel %vm1362_vm1, %v865_v38, %v1430_v50  ;;  %v899_v57 = vadd.f32 %v898_v44, %v897_v33 }
 0x127   : > { %v877_v53 = vadd.f32 %v876_v52, %v875_v32  ;;  %v888_v58 = vrot.slane %v887_v49, 1  ;;  %v894_v59 = vrot.slane %v893_v39, 1  ;;  %v902_v40 = vrot.slane %v369_v43, 4 }
 0x128   : > { %v1432_v60 = vsel %vm1364_vm2, %v871_v48, %v1431_v55  ;;  %v883_v62 = vadd.f32 %v882_v54, %v881_v42  ;;  %v900_v1 = vrot.slane %v899_v57, 1  ;;  %v908_v41 = vrot.slane %v370_v51, 4 }
 0x129   : > { %v1433_v63 = vsel %vm1366_vm3, %v877_v53, %v1432_v60  ;;  %v889_v2 = vadd.f32 %v888_v58, %v887_v49  ;;  %v895_v3 = vadd.f32 %v894_v59, %v893_v39  ;;  %v903_v5 = vadd.f32 %v902_v40, %v369_v43  ;;  %v377_v43 = vld [vmem:[%s2750_s12 + $0x2c8] sm:$0xff] }
 0x12a   : > { %v914_v6 = vrot.slane %v371_v56, 4  ;;  %v1434_v7 = vsel %vm1368_vm4, %v883_v62, %v1433_v63  ;;  %v901_v9 = vadd.f32 %v900_v1, %v899_v57  ;;  %v909_v10 = vadd.f32 %v908_v41, %v370_v51  ;;  %v378_v51 = vld [vmem:[%s2750_s12 + $0x2d0] sm:$0xff] }
 0x12b   : > { %v920_v11 = vrot.slane %v372_v61, 4  ;;  %v1435_v12 = vsel %vm1370_vm5, %v889_v2, %v1434_v7  ;;  %v904_v45 = vrot.slane %v903_v5, 2  ;;  %v926_v14 = vrot.slane %v373_v0, 4 }
 0x12c   : > { %v915_v13 = vadd.f32 %v914_v6, %v371_v56  ;;  %v1436_v16 = vsel %vm1372_vm6, %v895_v3, %v1435_v12  ;;  %v910_v46 = vrot.slane %v909_v10, 2  ;;  %v932_v18 = vrot.slane %v374_v4, 4  ;;  %v379_v56 = vld [vmem:[%s2750_s12 + $0x2d8] sm:$0xff]  ;;  %v384_v12 = vld [vmem:[%s2750_s12 + $0x300] sm:$0xff] }
 0x12d   : > { %v921_v17 = vadd.f32 %v920_v11, %v372_v61  ;;  %2064 = vmatmul.mubr.f32.gmra.mrb[8].mxu1 %v1436_v16  ;;  %v905_v19 = vadd.f32 %v904_v45, %v903_v5  ;;  %v927_v21 = vadd.f32 %v926_v14, %v373_v0  ;;  %v938_v22 = vrot.slane %v375_v8, 4  ;;  %v380_v61 = vld [vmem:[%s2750_s12 + $0x2e0] sm:$0xff]  ;;  %v381_v0 = vld [vmem:[%s2750_s12 + $0x2e8] sm:$0xff]  ;;  %v383_v5 = vld [vmem:[%s2750_s12 + $0x2f8] sm:$0xff] }
 0x12e   : > { %v916_v20 = vrot.slane %v915_v13, 2  ;;  %v911_v23 = vadd.f32 %v910_v46, %v909_v10  ;;  %v933_v25 = vadd.f32 %v932_v18, %v374_v4  ;;  %v944_v26 = vrot.slane %v376_v15, 4  ;;  %v382_v4 = vld [vmem:[%s2750_s12 + $0x2f0] sm:$0xff] }
 0x12f   : > { %v922_v24 = vrot.slane %v921_v17, 2  ;;  %v906_v27 = vrot.slane %v905_v19, 1  ;;  %v928_v29 = vrot.slane %v927_v21, 2  ;;  %v939_v30 = vadd.f32 %v938_v22, %v375_v8 }
 0x130   : > { %v917_v28 = vadd.f32 %v916_v20, %v915_v13  ;;  %v912_v31 = vrot.slane %v911_v23, 1  ;;  %v934_v47 = vrot.slane %v933_v25, 2  ;;  %v945_v33 = vadd.f32 %v944_v26, %v376_v15 }
 0x131   : > { %v923_v32 = vadd.f32 %v922_v24, %v921_v17  ;;  %v907_v34 = vadd.f32 %v906_v27, %v905_v19  ;;  %v929_v36 = vadd.f32 %v928_v29, %v927_v21  ;;  %v940_v37 = vrot.slane %v939_v30, 2 }
 0x132   : > { %v918_v35 = vrot.slane %v917_v28, 1  ;;  %v913_v38 = vadd.f32 %v912_v31, %v911_v23  ;;  %v935_v42 = vadd.f32 %v934_v47, %v933_v25  ;;  %v946_v44 = vrot.slane %v945_v33, 2 }
 0x133   : > { %v924_v52 = vrot.slane %v923_v32, 1  ;;  %v930_v49 = vrot.slane %v929_v36, 1  ;;  %v941_v39 = vadd.f32 %v940_v37, %v939_v30  ;;  %v1437_v50 = vsel %vm1360_vm0, %v907_v34, %v901_v9 }
 0x134   : > { %v919_v48 = vadd.f32 %v918_v35, %v917_v28  ;;  %v936_v54 = vrot.slane %v935_v42, 1  ;;  %v1438_v55 = vsel %vm1362_vm1, %v913_v38, %v1437_v50  ;;  %v947_v57 = vadd.f32 %v946_v44, %v945_v33  ;;  %v385_v44 = vld [vmem:[%s2750_s12 + $0x308] sm:$0xff]  ;;  %v386_v50 = vld [vmem:[%s2750_s12 + $0x310] sm:$0xff] }
 0x135   : > { %v925_v53 = vadd.f32 %v924_v52, %v923_v32  ;;  %v931_v58 = vadd.f32 %v930_v49, %v929_v36  ;;  %v942_v59 = vrot.slane %v941_v39, 1  ;;  %v950_v40 = vrot.slane %v377_v43, 4 }
 0x136   : > { %v1439_v60 = vsel %vm1364_vm2, %v919_v48, %v1438_v55  ;;  %v937_v62 = vadd.f32 %v936_v54, %v935_v42  ;;  %v948_v1 = vrot.slane %v947_v57, 1  ;;  %v956_v41 = vrot.slane %v378_v51, 4 }
 0x137   : > { %v1440_v63 = vsel %vm1366_vm3, %v925_v53, %v1439_v60  ;;  %v943_v2 = vadd.f32 %v942_v59, %v941_v39  ;;  %v951_v6 = vadd.f32 %v950_v40, %v377_v43  ;;  %v962_v7 = vrot.slane %v379_v56, 4  ;;  %v388_v60 = vld [vmem:[%s2750_s12 + $0x320] sm:$0xff] }
 0x138   : > { %v1441_v3 = vsel %vm1368_vm4, %v931_v58, %v1440_v63  ;;  %v949_v9 = vadd.f32 %v948_v1, %v947_v57  ;;  %v957_v10 = vadd.f32 %v956_v41, %v378_v51  ;;  %v968_v11 = vrot.slane %v380_v61, 4  ;;  %v387_v57 = vld [vmem:[%s2750_s12 + $0x318] sm:$0xff]  ;;  %v390_v41 = vld [vmem:[%s2750_s12 + $0x330] sm:$0xff] }
 0x139   : > { %v1442_v8 = vsel %vm1370_vm5, %v937_v62, %v1441_v3  ;;  %v952_v13 = vrot.slane %v951_v6, 2  ;;  %v963_v14 = vadd.f32 %v962_v7, %v379_v56  ;;  %v974_v15 = vrot.slane %v381_v0, 4 }
 0x13a   : > { %v1443_v45 = vsel %vm1372_vm6, %v943_v2, %v1442_v8  ;;  %v958_v16 = vrot.slane %v957_v10, 2  ;;  %v969_v46 = vadd.f32 %v968_v11, %v380_v61  ;;  %v980_v17 = vrot.slane %v382_v4, 4  ;;  %v389_v61 = vld [vmem:[%s2750_s12 + $0x328] sm:$0xff] }
 0x13b   : > { %2066 = vmatprep.mubr.f32.mxu1 %v1443_v45  ;;  %v986_v18 = vrot.slane %v383_v5, 4  ;;  %v953_v19 = vadd.f32 %v952_v13, %v951_v6  ;;  %v964_v20 = vrot.slane %v963_v14, 2  ;;  %v975_v21 = vadd.f32 %v974_v15, %v381_v0 }
 0x13c   : > { %v992_v22 = vrot.slane %v384_v12, 4  ;;  %v959_v23 = vadd.f32 %v958_v16, %v957_v10  ;;  %v970_v24 = vrot.slane %v969_v46, 2  ;;  %v981_v25 = vadd.f32 %v980_v17, %v382_v4  ;;  %v391_v4 = vld [vmem:[%s2750_s12 + $0x338] sm:$0xff] }
 0x13d   : > { %v987_v26 = vadd.f32 %v986_v18, %v383_v5  ;;  %v954_v27 = vrot.slane %v953_v19, 1  ;;  %v965_v28 = vadd.f32 %v964_v20, %v963_v14  ;;  %v976_v29 = vrot.slane %v975_v21, 2 }
 0x13e   : > { %v993_v30 = vadd.f32 %v992_v22, %v384_v12  ;;  %v960_v31 = vrot.slane %v959_v23, 1  ;;  %v971_v32 = vadd.f32 %v970_v24, %v969_v46  ;;  %v982_v47 = vrot.slane %v981_v25, 2  ;;  %v392_v12 = vld [vmem:[%s2750_s12 + $0x340] sm:$0xff] }
 0x13f   : > { %v988_v33 = vrot.slane %v987_v26, 2  ;;  %v955_v34 = vadd.f32 %v954_v27, %v953_v19  ;;  %v966_v35 = vrot.slane %v965_v28, 1  ;;  %v977_v36 = vadd.f32 %v976_v29, %v975_v21 }
 0x140   : > { %v994_v37 = vrot.slane %v993_v30, 2  ;;  %v961_v38 = vadd.f32 %v960_v31, %v959_v23  ;;  %v972_v52 = vrot.slane %v971_v32, 1  ;;  %v983_v42 = vadd.f32 %v982_v47, %v981_v25 }
 0x141   : > { %v989_v43 = vadd.f32 %v988_v33, %v987_v26  ;;  %v967_v48 = vadd.f32 %v966_v35, %v965_v28  ;;  %v978_v49 = vrot.slane %v977_v36, 1  ;;  %v1444_v39 = vsel %vm1360_vm0, %v955_v34, %v949_v9 }
 0x142   : > { %v995_v51 = vadd.f32 %v994_v37, %v993_v30  ;;  %v973_v53 = vadd.f32 %v972_v52, %v971_v32  ;;  %v984_v54 = vrot.slane %v983_v42, 1  ;;  %v1445_v56 = vsel %vm1362_vm1, %v961_v38, %v1444_v39 }
 0x143   : > { %v990_v55 = vrot.slane %v989_v43, 1  ;;  %v979_v58 = vadd.f32 %v978_v49, %v977_v36  ;;  %v1446_v59 = vsel %vm1364_vm2, %v967_v48, %v1445_v56  ;;  %v998_v62 = vrot.slane %v385_v44, 4 }
 0x144   : > { %v996_v40 = vrot.slane %v995_v51, 1  ;;  %v985_v63 = vadd.f32 %v984_v54, %v983_v42  ;;  %v1447_v1 = vsel %vm1366_vm3, %v973_v53, %v1446_v59  ;;  %v1004_v2 = vrot.slane %v386_v50, 4 }
 0x145   : > { %v991_v0 = vadd.f32 %v990_v55, %v989_v43  ;;  %v1448_v3 = vsel %vm1368_vm4, %v979_v58, %v1447_v1  ;;  %v999_v6 = vadd.f32 %v998_v62, %v385_v44  ;;  %v1010_v7 = vrot.slane %v387_v57, 4  ;;  %v393_v44 = vld [vmem:[%s2750_s12 + $0x348] sm:$0xff]  ;;  %v396_v58 = vld [vmem:[%s2750_s12 + $0x360] sm:$0xff]  ;;  %v398_v1 = vld [vmem:[%s2750_s12 + $0x370] sm:$0xff] }
 0x146   : > { %v997_v5 = vadd.f32 %v996_v40, %v995_v51  ;;  %v1449_v8 = vsel %vm1370_vm5, %v985_v63, %v1448_v3  ;;  %v1005_v9 = vadd.f32 %v1004_v2, %v386_v50  ;;  %v1016_v10 = vrot.slane %v388_v60, 4  ;;  %v394_v50 = vld [vmem:[%s2750_s12 + $0x350] sm:$0xff]  ;;  %v395_v51 = vld [vmem:[%s2750_s12 + $0x358] sm:$0xff] }
 0x147   : > { %v1022_v11 = vrot.slane %v389_v61, 4  ;;  %v1450_v45 = vsel %vm1372_vm6, %v991_v0, %v1449_v8  ;;  %v1000_v13 = vrot.slane %v999_v6, 2  ;;  %v1011_v14 = vadd.f32 %v1010_v7, %v387_v57 }
 0x148   : > { %v1028_v15 = vrot.slane %v390_v41, 4  ;;  %2067 = vmatmul.mubr.f32.gmra.mrb[10].mxu1 %v1450_v45  ;;  %v1006_v16 = vrot.slane %v1005_v9, 2  ;;  %v1017_v46 = vadd.f32 %v1016_v10, %v388_v60  ;;  %v1034_v18 = vrot.slane %v391_v4, 4 }
 0x149   : > { %v1023_v17 = vadd.f32 %v1022_v11, %v389_v61  ;;  %v1001_v19 = vadd.f32 %v1000_v13, %v999_v6  ;;  %v1012_v20 = vrot.slane %v1011_v14, 2  ;;  %v1040_v22 = vrot.slane %v392_v12, 4  ;;  %v397_v61 = vld [vmem:[%s2750_s12 + $0x368] sm:$0xff] }
 0x14a   : > { %v1029_v21 = vadd.f32 %v1028_v15, %v390_v41  ;;  %v1007_v23 = vadd.f32 %v1006_v16, %v1005_v9  ;;  %v1018_v24 = vrot.slane %v1017_v46, 2  ;;  %v1035_v26 = vadd.f32 %v1034_v18, %v391_v4  ;;  %v399_v4 = vld [vmem:[%s2750_s12 + $0x378] sm:$0xff] }
 0x14b   : > { %v1024_v25 = vrot.slane %v1023_v17, 2  ;;  %v1002_v27 = vrot.slane %v1001_v19, 1  ;;  %v1013_v28 = vadd.f32 %v1012_v20, %v1011_v14  ;;  %v1041_v30 = vadd.f32 %v1040_v22, %v392_v12  ;;  %v400_v12 = vld [vmem:[%s2750_s12 + $0x380] sm:$0xff] }
 0x14c   : > { %v1030_v29 = vrot.slane %v1029_v21, 2  ;;  %v1008_v31 = vrot.slane %v1007_v23, 1  ;;  %v1019_v32 = vadd.f32 %v1018_v24, %v1017_v46  ;;  %v1036_v33 = vrot.slane %v1035_v26, 2 }
 0x14d   : > { %v1025_v47 = vadd.f32 %v1024_v25, %v1023_v17  ;;  %v1003_v34 = vadd.f32 %v1002_v27, %v1001_v19  ;;  %v1014_v35 = vrot.slane %v1013_v28, 1  ;;  %v1042_v37 = vrot.slane %v1041_v30, 2 }
 0x14e   : > { %v1031_v36 = vadd.f32 %v1030_v29, %v1029_v21  ;;  %v1009_v38 = vadd.f32 %v1008_v31, %v1007_v23  ;;  %v1020_v52 = vrot.slane %v1019_v32, 1  ;;  %v1037_v43 = vadd.f32 %v1036_v33, %v1035_v26 }
 0x14f   : > { %v1026_v42 = vrot.slane %v1025_v47, 1  ;;  %v1015_v48 = vadd.f32 %v1014_v35, %v1013_v28  ;;  %v1451_v39 = vsel %vm1360_vm0, %v1003_v34, %v997_v5  ;;  %v1043_v53 = vadd.f32 %v1042_v37, %v1041_v30  ;;  %v401_v37 = vld [vmem:[%s2750_s12 + $0x388] sm:$0xff] }
 0x150   : > { %v1032_v49 = vrot.slane %v1031_v36, 1  ;;  %v1021_v54 = vadd.f32 %v1020_v52, %v1019_v32  ;;  %v1038_v56 = vrot.slane %v1037_v43, 1  ;;  %v1452_v57 = vsel %vm1362_vm1, %v1009_v38, %v1451_v39 }
 0x151   : > { %v1027_v55 = vadd.f32 %v1026_v42, %v1025_v47  ;;  %v1453_v60 = vsel %vm1364_vm2, %v1015_v48, %v1452_v57  ;;  %v1044_v40 = vrot.slane %v1043_v53, 1  ;;  %v1046_v62 = vrot.slane %v393_v44, 4  ;;  %v402_v48 = vld [vmem:[%s2750_s12 + $0x390] sm:$0xff]  ;;  %v404_v57 = vld [vmem:[%s2750_s12 + $0x3a0] sm:$0xff] }
 0x152   : > { %v1033_v59 = vadd.f32 %v1032_v49, %v1031_v36  ;;  %v1039_v63 = vadd.f32 %v1038_v56, %v1037_v43  ;;  %v1454_v0 = vsel %vm1366_vm3, %v1021_v54, %v1453_v60  ;;  %v1052_v41 = vrot.slane %v394_v50, 4 }
 0x153   : > { %v1058_v2 = vrot.slane %v395_v51, 4  ;;  %v1455_v3 = vsel %vm1368_vm4, %v1027_v55, %v1454_v0  ;;  %v1045_v5 = vadd.f32 %v1044_v40, %v1043_v53  ;;  %v1047_v6 = vadd.f32 %v1046_v62, %v393_v44 }
 0x154   : > { %v1064_v7 = vrot.slane %v396_v58, 4  ;;  %v1456_v8 = vsel %vm1370_vm5, %v1033_v59, %v1455_v3  ;;  %v1053_v9 = vadd.f32 %v1052_v41, %v394_v50  ;;  %v1070_v11 = vrot.slane %v397_v61, 4 }
 0x155   : > { %v1059_v10 = vadd.f32 %v1058_v2, %v395_v51  ;;  %v1457_v45 = vsel %vm1372_vm6, %v1039_v63, %v1456_v8  ;;  %v1048_v13 = vrot.slane %v1047_v6, 2  ;;  %v1076_v15 = vrot.slane %v398_v1, 4  ;;  %v403_v51 = vld [vmem:[%s2750_s12 + $0x398] sm:$0xff] }
 0x156   : > { %v1065_v14 = vadd.f32 %v1064_v7, %v396_v58  ;;  %2069 = vmatprep.mubr.f32.mxu1 %v1457_v45  ;;  %v1054_v16 = vrot.slane %v1053_v9, 2  ;;  %v1071_v17 = vadd.f32 %v1070_v11, %v397_v61  ;;  %v1082_v18 = vrot.slane %v399_v4, 4  ;;  %v405_v61 = vld [vmem:[%s2750_s12 + $0x3a8] sm:$0xff] }
 0x157   : > { %v1060_v46 = vrot.slane %v1059_v10, 2  ;;  %v1049_v19 = vadd.f32 %v1048_v13, %v1047_v6  ;;  %v1077_v21 = vadd.f32 %v1076_v15, %v398_v1  ;;  %v1088_v22 = vrot.slane %v400_v12, 4  ;;  %v406_v1 = vld [vmem:[%s2750_s12 + $0x3b0] sm:$0xff] }
 0x158   : > { %v1066_v20 = vrot.slane %v1065_v14, 2  ;;  %v1055_v23 = vadd.f32 %v1054_v16, %v1053_v9  ;;  %v1072_v25 = vrot.slane %v1071_v17, 2  ;;  %v1083_v26 = vadd.f32 %v1082_v18, %v399_v4  ;;  %v407_v4 = vld [vmem:[%s2750_s12 + $0x3b8] sm:$0xff] }
 0x159   : > { %v1061_v24 = vadd.f32 %v1060_v46, %v1059_v10  ;;  %v1050_v27 = vrot.slane %v1049_v19, 1  ;;  %v1078_v29 = vrot.slane %v1077_v21, 2  ;;  %v1089_v30 = vadd.f32 %v1088_v22, %v400_v12  ;;  %v408_v12 = vld [vmem:[%s2750_s12 + $0x3c0] sm:$0xff] }
 0x15a   : > { %v1067_v28 = vadd.f32 %v1066_v20, %v1065_v14  ;;  %v1056_v31 = vrot.slane %v1055_v23, 1  ;;  %v1073_v47 = vadd.f32 %v1072_v25, %v1071_v17  ;;  %v1084_v33 = vrot.slane %v1083_v26, 2 }
 0x15b   : > { %v1062_v32 = vrot.slane %v1061_v24, 1  ;;  %v1051_v34 = vadd.f32 %v1050_v27, %v1049_v19  ;;  %v1079_v36 = vadd.f32 %v1078_v29, %v1077_v21  ;;  %v1090_v38 = vrot.slane %v1089_v30, 2 }
 0x15c   : > { %v1068_v35 = vrot.slane %v1067_v28, 1  ;;  %v1057_v52 = vadd.f32 %v1056_v31, %v1055_v23  ;;  %v1074_v43 = vrot.slane %v1073_v47, 1  ;;  %v1085_v44 = vadd.f32 %v1084_v33, %v1083_v26 }
 0x15d   : > { %v1063_v42 = vadd.f32 %v1062_v32, %v1061_v24  ;;  %v1080_v39 = vrot.slane %v1079_v36, 1  ;;  %v1458_v50 = vsel %vm1360_vm0, %v1051_v34, %v1045_v5  ;;  %v1091_v53 = vadd.f32 %v1090_v38, %v1089_v30 }
 0x15e   : > { %v1069_v49 = vadd.f32 %v1068_v35, %v1067_v28  ;;  %v1075_v54 = vadd.f32 %v1074_v43, %v1073_v47  ;;  %v1086_v55 = vrot.slane %v1085_v44, 1  ;;  %v1459_v56 = vsel %vm1362_vm1, %v1057_v52, %v1458_v50 }
 0x15f   : > { %v1094_v58 = vrot.slane %v401_v37, 4  ;;  %v1081_v59 = vadd.f32 %v1080_v39, %v1079_v36  ;;  %v1460_v60 = vsel %vm1364_vm2, %v1063_v42, %v1459_v56  ;;  %v1092_v40 = vrot.slane %v1091_v53, 1 }
 0x160   : > { %v1100_v62 = vrot.slane %v402_v48, 4  ;;  %v1087_v63 = vadd.f32 %v1086_v55, %v1085_v44  ;;  %v1461_v0 = vsel %vm1366_vm3, %v1069_v49, %v1460_v60  ;;  %v1106_v2 = vrot.slane %v403_v51, 4 }
 0x161   : > { %v1095_v41 = vadd.f32 %v1094_v58, %v401_v37  ;;  %v1462_v3 = vsel %vm1368_vm4, %v1075_v54, %v1461_v0  ;;  %v1093_v5 = vadd.f32 %v1092_v40, %v1091_v53  ;;  %v1112_v7 = vrot.slane %v404_v57, 4  ;;  %v409_v37 = vld [vmem:[%s2750_s12 + $0x3c8] sm:$0xff]  ;;  %v414_v0 = vld [vmem:[%s2750_s12 + $0x3f0] sm:$0xff] }
 0x162   : > { %v1101_v6 = vadd.f32 %v1100_v62, %v402_v48  ;;  %v1463_v8 = vsel %vm1370_vm5, %v1081_v59, %v1462_v3  ;;  %v1107_v10 = vadd.f32 %v1106_v2, %v403_v51  ;;  %v1118_v11 = vrot.slane %v405_v61, 4  ;;  %v410_v48 = vld [vmem:[%s2750_s12 + $0x3d0] sm:$0xff]  ;;  %v411_v51 = vld [vmem:[%s2750_s12 + $0x3d8] sm:$0xff] }
 0x163   : > { %v1096_v9 = vrot.slane %v1095_v41, 2  ;;  %v1464_v45 = vsel %vm1372_vm6, %v1087_v63, %v1463_v8  ;;  %v1113_v14 = vadd.f32 %v1112_v7, %v404_v57  ;;  %v1124_v15 = vrot.slane %v406_v1, 4  ;;  %v412_v57 = vld [vmem:[%s2750_s12 + $0x3e0] sm:$0xff] }
 0x164   : > { %v1102_v13 = vrot.slane %v1101_v6, 2  ;;  %2070 = vmatmul.mubr.f32.gmra.mrb[12].mxu1 %v1464_v45  ;;  %v1108_v46 = vrot.slane %v1107_v10, 2  ;;  %v1119_v17 = vadd.f32 %v1118_v11, %v405_v61  ;;  %v1130_v18 = vrot.slane %v407_v4, 4  ;;  %v413_v61 = vld [vmem:[%s2750_s12 + $0x3e8] sm:$0xff] }
 0x165   : > { %v1097_v16 = vadd.f32 %v1096_v9, %v1095_v41  ;;  %v1114_v20 = vrot.slane %v1113_v14, 2  ;;  %v1125_v21 = vadd.f32 %v1124_v15, %v406_v1  ;;  %v1136_v22 = vrot.slane %v408_v12, 4  ;;  %v415_v1 = vld [vmem:[%s2750_s12 + $0x3f8] sm:$0xff] }
 0x166   : > { %v1103_v19 = vadd.f32 %v1102_v13, %v1101_v6  ;;  %v1109_v24 = vadd.f32 %v1108_v46, %v1107_v10  ;;  %v1120_v25 = vrot.slane %v1119_v17, 2  ;;  %v1131_v26 = vadd.f32 %v1130_v18, %v407_v4 }
 0x167   : > { %v1098_v23 = vrot.slane %v1097_v16, 1  ;;  %v1115_v28 = vadd.f32 %v1114_v20, %v1113_v14  ;;  %v1126_v29 = vrot.slane %v1125_v21, 2  ;;  %v1137_v30 = vadd.f32 %v1136_v22, %v408_v12 }
 0x168   : > { %v1104_v27 = vrot.slane %v1103_v19, 1  ;;  %v1110_v32 = vrot.slane %v1109_v24, 1  ;;  %v1121_v47 = vadd.f32 %v1120_v25, %v1119_v17  ;;  %v1132_v33 = vrot.slane %v1131_v26, 2 }
 0x169   : > { %v1099_v31 = vadd.f32 %v1098_v23, %v1097_v16  ;;  %v1116_v35 = vrot.slane %v1115_v28, 1  ;;  %v1127_v36 = vadd.f32 %v1126_v29, %v1125_v21  ;;  %v1138_v38 = vrot.slane %v1137_v30, 2 }
 0x16a   : > { %v1105_v34 = vadd.f32 %v1104_v27, %v1103_v19  ;;  %v1111_v52 = vadd.f32 %v1110_v32, %v1109_v24  ;;  %v1122_v42 = vrot.slane %v1121_v47, 1  ;;  %v1133_v43 = vadd.f32 %v1132_v33, %v1131_v26 }
 0x16b   : > { %v1465_v44 = vsel %vm1360_vm0, %v1099_v31, %v1093_v5  ;;  %v1117_v49 = vadd.f32 %v1116_v35, %v1115_v28  ;;  %v1128_v39 = vrot.slane %v1127_v36, 1  ;;  %v1139_v53 = vadd.f32 %v1138_v38, %v1137_v30 }
 0x16c   : > { %v1466_v50 = vsel %vm1362_vm1, %v1105_v34, %v1465_v44  ;;  %v1123_v54 = vadd.f32 %v1122_v42, %v1121_v47  ;;  %v1134_v55 = vrot.slane %v1133_v43, 1  ;;  %v1142_v58 = vrot.slane %v409_v37, 4 }
 0x16d   : > { %v1467_v56 = vsel %vm1364_vm2, %v1111_v52, %v1466_v50  ;;  %v1129_v59 = vadd.f32 %v1128_v39, %v1127_v36  ;;  %v1148_v40 = vrot.slane %v410_v48, 4  ;;  %v1154_v2 = vrot.slane %v411_v51, 4 }
 0x16e   : > { %v1468_v60 = vsel %vm1366_vm3, %v1117_v49, %v1467_v56  ;;  %v1135_v62 = vadd.f32 %v1134_v55, %v1133_v43  ;;  %v1143_v41 = vadd.f32 %v1142_v58, %v409_v37  ;;  %v1140_v4 = vrot.slane %v1139_v53, 1 }
 0x16f   : > { %v1469_v63 = vsel %vm1368_vm4, %v1123_v54, %v1468_v60  ;;  %v1149_v5 = vadd.f32 %v1148_v40, %v410_v48  ;;  %v1160_v6 = vrot.slane %v412_v57, 4  ;;  %v1155_v9 = vadd.f32 %v1154_v2, %v411_v51 }
 0x170   : > { %v1470_v3 = vsel %vm1370_vm5, %v1129_v59, %v1469_v63  ;;  %v1144_v8 = vrot.slane %v1143_v41, 2  ;;  %v1166_v10 = vrot.slane %v413_v61, 4  ;;  %v1172_v45 = vrot.slane %v414_v0, 4 }
 0x171   : > { %v1471_v7 = vsel %vm1372_vm6, %v1135_v62, %v1470_v3  ;;  %v1150_v11 = vrot.slane %v1149_v5, 2  ;;  %v1161_v12 = vadd.f32 %v1160_v6, %v412_v57  ;;  %v1178_v13 = vrot.slane %v415_v1, 4 }
 0x172   : > { %2072 = vmatprep.mubr.f32.mxu1 %v1471_v7  ;;  %v1145_v14 = vadd.f32 %v1144_v8, %v1143_v41  ;;  %v1156_v15 = vrot.slane %v1155_v9, 2  ;;  %v1167_v16 = vadd.f32 %v1166_v10, %v413_v61  ;;  %v1173_v18 = vadd.f32 %v1172_v45, %v414_v0 }
 0x173   : > { %v1151_v46 = vadd.f32 %v1150_v11, %v1149_v5  ;;  %v1162_v17 = vrot.slane %v1161_v12, 2  ;;  %v1179_v19 = vadd.f32 %v1178_v13, %v415_v1  ;;  %v1141_v20 = vadd.f32 %v1140_v4, %v1139_v53 }
 0x174   : > { %v1146_v21 = vrot.slane %v1145_v14, 1  ;;  %v1157_v22 = vadd.f32 %v1156_v15, %v1155_v9  ;;  %v1168_v23 = vrot.slane %v1167_v16, 2  ;;  %v1174_v26 = vrot.slane %v1173_v18, 2 }
 0x175   : > { %v1152_v24 = vrot.slane %v1151_v46, 1  ;;  %v1163_v25 = vadd.f32 %v1162_v17, %v1161_v12  ;;  %v1180_v27 = vrot.slane %v1179_v19, 2 }
 0x176   : > { %v1147_v28 = vadd.f32 %v1146_v21, %v1145_v14  ;;  %v1158_v29 = vrot.slane %v1157_v22, 1  ;;  %v1169_v30 = vadd.f32 %v1168_v23, %v1167_v16  ;;  %v1175_v47 = vadd.f32 %v1174_v26, %v1173_v18 }
 0x177   : > { %v1153_v31 = vadd.f32 %v1152_v24, %v1151_v46  ;;  %v1164_v32 = vrot.slane %v1163_v25, 1  ;;  %v1181_v33 = vadd.f32 %v1180_v27, %v1179_v19 }
 0x178   : > { %v1159_v34 = vadd.f32 %v1158_v29, %v1157_v22  ;;  %v1170_v35 = vrot.slane %v1169_v30, 1  ;;  %v1472_v36 = vsel %vm1360_vm0, %v1147_v28, %v1141_v20  ;;  %v1176_v38 = vrot.slane %v1175_v47, 1 }
 0x179   : > { %v1165_v37 = vadd.f32 %v1164_v32, %v1163_v25  ;;  %v1182_v52 = vrot.slane %v1181_v33, 1  ;;  %v1473_v42 = vsel %vm1362_vm1, %v1153_v31, %v1472_v36 }
 0x17a   : > { %v1171_v43 = vadd.f32 %v1170_v35, %v1169_v30  ;;  %v1474_v44 = vsel %vm1364_vm2, %v1159_v34, %v1473_v42  ;;  %v1177_v48 = vadd.f32 %v1176_v38, %v1175_v47 }
 0x17b   : > { %v1183_v49 = vadd.f32 %v1182_v52, %v1181_v33  ;;  %v1475_v39 = vsel %vm1366_vm3, %v1165_v37, %v1474_v44 }
 0x17c   : > { %v1476_v50 = vsel %vm1368_vm4, %v1171_v43, %v1475_v39 }
 0x17d   : > { %v1477_v51 = vsel %vm1370_vm5, %v1177_v48, %v1476_v50 }
 0x17e   : > { %v1478_v53 = vsel %vm1372_vm6, %v1183_v49, %v1477_v51 }
 0x17f   : > { %2073 = vmatmul.mubr.f32.gmra.mrb[14].mxu1 %v1478_v53 }
 0x18a   : > { %v2109_v54 = vpop.f32.mrb[0].mxu0 }
 0x18b   : > { %v1706_v55 = vpop.f32.mrb[1].mxu0 }
 0x18e   : > { %v2112_v56 = vpop.f32.mrb[2].mxu0 }
 0x18f   : > { %v1716_v57 = vpop.f32.mrb[3].mxu0 }
 0x192   : > { %v2115_v58 = vpop.f32.mrb[4].mxu0 }
 0x193   : > { %v2053_v59 = vpop.f32.mrb[0].mxu1  ;;  %v1726_v60 = vpop.f32.mrb[5].mxu0 }
 0x194   : > { %v1712_v61 = vadd.f32 %v2109_v54, %v2053_v59  ;;  %v1561_v40 = vpop.f32.mrb[1].mxu1 }
 0x195   : > { %v1707_v62 = vadd.f32 %v1706_v55, %v1561_v40 }
 0x196   : > { %1786 = vst [vmem:[%s3054_s21 + $0x8] sm:$0xff] %v1712_v61  ;;  %v2118_v63 = vpop.f32.mrb[6].mxu0 }
 0x197   : > { %1785 = vst [vmem:[%s3054_s21] sm:$0xff] %v1707_v62  ;;  %v1736_v0 = vpop.f32.mrb[7].mxu0 }
 0x19a   : > { %v2121_v1 = vpop.f32.mrb[8].mxu0 }
 0x19b   : > { %v1746_v41 = vpop.f32.mrb[9].mxu0 }
 0x19e   : > { %v2124_v2 = vpop.f32.mrb[10].mxu0 }
 0x19f   : > { %v1756_v3 = vpop.f32.mrb[11].mxu0 }
 0x1ac   : > { %v2127_v8 = vpop.f32.mrb[12].mxu0 }
 0x1ad   : > { %v1766_v9 = vpop.f32.mrb[13].mxu0 }
 0x1af   : > { %v2056_v4 = vpop.f32.mrb[2].mxu1 }
 0x1b0   : > { %v1722_v5 = vadd.f32 %v2112_v56, %v2056_v4  ;;  %v1571_v6 = vpop.f32.mrb[3].mxu1 }
 0x1b1   : > { %v1717_v7 = vadd.f32 %v1716_v57, %v1571_v6 }
 0x1b2   : > { %1788 = vst [vmem:[%s3054_s21 + $0x18] sm:$0xff] %v1722_v5 }
 0x1b3   : > { %1787 = vst [vmem:[%s3054_s21 + $0x10] sm:$0xff] %v1717_v7 }
 0x1c7   : > { %v2130_v13 = vpop.f32.mrb[14].mxu0 }
 0x1c8   : > { %v1776_v14 = vpop.f32.mrb[15].mxu0 }
 0x1c9   : > { %v2059_v10 = vpop.f32.mrb[4].mxu1 }
 0x1ca   : > { %v1732_v11 = vadd.f32 %v2115_v58, %v2059_v10  ;;  %v1581_v12 = vpop.f32.mrb[5].mxu1 }
 0x1cb   : > { %v1727_v45 = vadd.f32 %v1726_v60, %v1581_v12 }
 0x1cc   : > { %1790 = vst [vmem:[%s3054_s21 + $0x28] sm:$0xff] %v1732_v11 }
 0x1cd   : > { %1789 = vst [vmem:[%s3054_s21 + $0x20] sm:$0xff] %v1727_v45 }
 0x1e5   : > { %v2062_v15 = vpop.f32.mrb[6].mxu1 }
 0x1e6   : > { %v1742_v16 = vadd.f32 %v2118_v63, %v2062_v15  ;;  %v1591_v46 = vpop.f32.mrb[7].mxu1 }
 0x1e7   : > { %v1737_v17 = vadd.f32 %v1736_v0, %v1591_v46 }
 0x1e8   : > { %1792 = vst [vmem:[%s3054_s21 + $0x38] sm:$0xff] %v1742_v16 }
 0x1e9   : > { %1791 = vst [vmem:[%s3054_s21 + $0x30] sm:$0xff] %v1737_v17 }
 0x200   : > { %v2065_v18 = vpop.f32.mrb[8].mxu1 }
 0x201   : > { %v1752_v19 = vadd.f32 %v2121_v1, %v2065_v18  ;;  %v1601_v20 = vpop.f32.mrb[9].mxu1 }
 0x202   : > { %v1747_v21 = vadd.f32 %v1746_v41, %v1601_v20 }
 0x203   : > { %1794 = vst [vmem:[%s3054_s21 + $0x48] sm:$0xff] %v1752_v19 }
 0x204   : > { %1793 = vst [vmem:[%s3054_s21 + $0x40] sm:$0xff] %v1747_v21 }
 0x21b   : > { %v2068_v22 = vpop.f32.mrb[10].mxu1 }
 0x21c   : > { %v1762_v23 = vadd.f32 %v2124_v2, %v2068_v22  ;;  %v1611_v24 = vpop.f32.mrb[11].mxu1 }
 0x21d   : > { %v1757_v25 = vadd.f32 %v1756_v3, %v1611_v24 }
 0x21e   : > { %1796 = vst [vmem:[%s3054_s21 + $0x58] sm:$0xff] %v1762_v23 }
 0x21f   : > { %1795 = vst [vmem:[%s3054_s21 + $0x50] sm:$0xff] %v1757_v25 }
 0x237   : > { %v2071_v26 = vpop.f32.mrb[12].mxu1 }
 0x238   : > { %v1772_v27 = vadd.f32 %v2127_v8, %v2071_v26  ;;  %v1621_v28 = vpop.f32.mrb[13].mxu1 }
 0x239   : > { %v1767_v29 = vadd.f32 %v1766_v9, %v1621_v28 }
 0x23a   : > { %1798 = vst [vmem:[%s3054_s21 + $0x68] sm:$0xff] %v1772_v27 }
 0x23b   : > { %1797 = vst [vmem:[%s3054_s21 + $0x60] sm:$0xff] %v1767_v29 }
 0x252   : > { %v2074_v30 = vpop.f32.mrb[14].mxu1 }
 0x253   : > { %v1782_v31 = vadd.f32 %v2130_v13, %v2074_v30  ;;  %v1631_v32 = vpop.f32.mrb[15].mxu1 }
 0x254   : > { %v1777_v47 = vadd.f32 %v1776_v14, %v1631_v32 }
 0x255   : > { %1800 = vst [vmem:[%s3054_s21 + $0x78] sm:$0xff] %v1782_v31 }
 0x256   : > { %1799 = vst [vmem:[%s3054_s21 + $0x70] sm:$0xff] %v1777_v47 }
 0x257   : > { %2416 = shalt.err (!%p2413_p11)
}
 0x258   : > { %s2417_s28 = scalar_lea.hbm %s3075_s9, 2048  ;;  %s2421_s25 = scalar_lea.hbm %s3126_s4, 8192 }
 0x259   : > { %p2418_p0 = scmp.ne.s32.totalorder %s3075_s9, %s2417_s28  ;;  %p2422_p13 = scmp.lt.u32.totalorder %s3075_s9, %s3126_s4 }
 0x25a   : > { %p2423_p3 = scmp.lt.u32.totalorder %s2421_s25, %s2417_s28  ;;  %p2425_p9 = scmp.lt.u32.totalorder %s2417_s28, %s3075_s9 }
 0x25b   : > { %p2419_p2 = pnand %p2418_p0, %p2635_p6 }
 0x25c   : > { %p2424_p7 = por %p2423_p3, %p2422_p13 }
 0x25d   : > { %p2420_p10 = pneg %p2419_p2 }
 0x25e   : > { %p2426_p12 = por %p2425_p9, %p2424_p7 }
 0x260   : > { %p2427_p5 = pnand %p2426_p12, %p2420_p10 }
 0x262   : > { %2430 = shalt.err (!%p2427_p5)
}
 0x263   : > { %s2490_s11 = smov 128   ;;  %s2491_s12 = smov 8  }
 0x264   : > { %2223 = dma.vmem_to_hbm [thread:$0]  (%p2635_p6), %s3077_s24, 2048, %s3075_s9, %s1802_s10, %s2490_s11, %s2490_s11, %s2491_s12  }
 0x265 PF: > { %p2248_p1 = scmp.ge.s32.totalorder %s2481_s18, 2  ;;  %s1830_s21 = sand.u32 1, %s2469_s15  }
 0x266   : > { %p3148_p4 = scmp.ne.s32.totalorder %s3133_s22, 0  ;;  %s1831_s5 = scalar_lea.sflag [#allocation4], %s1830_s21 }
 0x268   : > { %p2240_p8 = pnand %p2248_p1, %p3148_p4 }
 0x26a   : > { %2464 = dma.done.wait (!%p2240_p8), %s1831_s5, 2048  }
 0x26b   : > { %2466 = vsyncadd (!%p2240_p8), %s1831_s5, 4294965248  ;;  %p21_p11 = scmp.ge.s32.totalorder %s2625_s26, 6   ;;  %s3149_s15 = smov %s2473_s16 }
 0x26c   : > { %s3150_s16 = smov %s2477_s17  ;;  %s3151_s17 = smov %s2641_s14 }
 0x26d   : > { %s3152_s18 = smov %s2625_s26  ;;  %23 = sbr.rel (!%p21_p11) target bundleno = 11 (0xb), region = 102 }
 0x274   :  { %1836 = vsyncpa [#allocation3], 1 }
 0x275   :  { %1838 = vsyncpa [#allocation3 + $0x1], 1 }
 0x276   :  { %1839 = vsyncpa [#allocation6], 1 }
 0x277   :  { %1841 = vsyncpa [#allocation6 + $0x1], 1 }
 0x278   :  { %1842 = vsyncpa [#allocation9], 1 }
 0x279   :  { %1843 = vsyncpa [#allocation4], 1 }
 0x27a   :  { %1845 = vsyncpa [#allocation4 + $0x1], 1 }

</bundles_post_ra>
